<compile_context>
chip_gen: v7x
topology: tpu7x:2x2x1
jax: 0.10.0
libtpu: 0.0.40
codegen_flags: <defaults>
</compile_context>

<pallas_src>
import jax
import jax.numpy as jnp
from jax import lax
from jax.experimental import pallas as pl
from jax.experimental.pallas import tpu as pltpu

LANES = 128          # f32 lane width of a vreg
STRIP = 32           # rows per in-register strip (32x128 f32 = 4 vregs/value)
UNROLL_H_FULL = 128  # fully unroll the hidden loop up to this many units


def _mlp_kernel(params_ref, x_ref, o_ref):
    """Fused Linear(1,H) -> tanh -> Linear(H,1) on a lane-dense slab tile.

    params_ref: (3H+1,) f32 in SMEM, packed [w1 | b1 | w2 | b2].
    x_ref:      (tile_r, 128) input slab (f32 or bf16) in VMEM.
    o_ref:      (tile_r, 128) f32 output slab in VMEM.
    """
    H = (params_ref.shape[0] - 1) // 3
    tile_r = x_ref.shape[0]
    n_strips = tile_r // STRIP
    b2 = params_ref[3 * H]

    def do_strip(s):
        r0 = pl.multiple_of(s * STRIP, STRIP)
        # Strip stays resident in vregs for the whole H reduction.
        x = x_ref[pl.ds(r0, STRIP), :].astype(jnp.float32)
        # Two partial accumulators break the serial add chain; acc0 is seeded
        # with b2 (saves one full-strip VALU pass at the end).
        acc0 = jnp.full_like(x, b2)
        acc1 = jnp.zeros_like(x)

        if H <= UNROLL_H_FULL:
            # Small H: full unroll. SMEM scalar reads ride as scalar operands
            # of the vector mul/add; tanh goes to the EUP slot.
            for j in range(H):
                c = params_ref[2 * H + j] * jnp.tanh(
                    x * params_ref[j] + params_ref[H + j])
                if j % 2 == 0:
                    acc0 = acc0 + c
                else:
                    acc1 = acc1 + c
        else:
            # Large H: bounded unroll, two hidden units per iteration.
            Hh = H // 2

            def h_body(j, carry):
                a0, a1 = carry
                c0 = params_ref[2 * H + j] * jnp.tanh(
                    x * params_ref[j] + params_ref[H + j])
                k = j + Hh
                c1 = params_ref[2 * H + k] * jnp.tanh(
                    x * params_ref[k] + params_ref[H + k])
                return a0 + c0, a1 + c1

            acc0, acc1 = lax.fori_loop(0, Hh, h_body, (acc0, acc1),
                                       unroll=min(8, max(1, Hh)))
            if H % 2 == 1:
                j = H - 1
                acc0 = acc0 + params_ref[2 * H + j] * jnp.tanh(
                    x * params_ref[j] + params_ref[H + j])

        # Lane-dense unmasked store of this strip.
        o_ref[pl.ds(r0, STRIP), :] = (acc0 + acc1).astype(o_ref.dtype)

    if n_strips == 1:
        do_strip(0)
    else:
        @pl.loop(0, n_strips)
        def _(s):
            do_strip(s)


def red_neuronal_forward(x, w1, b1, w2, b2, *, max_tile_r=2048):
    """Forward pass of RedNeuronal.

    x:  (N, 1) float32 / bfloat16
    w1: (H, 1), b1: (H,), w2: (1, H), b2: (1,)  -- PyTorch nn.Linear shapes.
    Returns (N, 1) float32 (the compute dtype).
    """
    N = x.shape[0]
    H = w1.shape[0]

    # Keep bf16 inputs in bf16 in HBM (half the read traffic); cast to f32
    # inside the kernel.  Everything else is upcast to f32 in the wrapper.
    if x.dtype != jnp.bfloat16:
        x = x.astype(jnp.float32)

    # --- lane-dense slab layout ---------------------------------------------
    R = -(-N // LANES)                         # rows of the (., 128) slab
    R_aligned = -(-R // STRIP) * STRIP         # strip-aligned row count
    tile_r = max(STRIP, min(max_tile_r, R_aligned))
    # Give the grid >= 2 steps when the batch allows it, so the "parallel"
    # grid axis can shard across v7x's two TensorCores (no-op on v5e/v6e).
    if R_aligned >= 2 * STRIP and -(-R_aligned // tile_r) < 2:
        tile_r = -(-(R_aligned // 2) // STRIP) * STRIP
    R_pad = -(-R_aligned // tile_r) * tile_r
    N_pad = R_pad * LANES

    x_flat = x.reshape(-1)
    if N_pad != N:
        x_flat = jnp.pad(x_flat, (0, N_pad - N))
    x_slab = x_flat.reshape(R_pad, LANES)

    # Single packed SMEM parameter vector: [w1 | b1 | w2 | b2]  -> (3H+1,)
    params = jnp.concatenate([
        w1.reshape(H).astype(jnp.float32),
        b1.reshape(H).astype(jnp.float32),
        w2.reshape(H).astype(jnp.float32),
        b2.reshape(1).astype(jnp.float32),
    ])

    grid = (R_pad // tile_r,)
    out_slab = pl.pallas_call(
        _mlp_kernel,
        out_shape=jax.ShapeDtypeStruct((R_pad, LANES), jnp.float32),
        grid=grid,
        in_specs=[
            pl.BlockSpec(memory_space=pltpu.MemorySpace.SMEM),   # packed params
            pl.BlockSpec((tile_r, LANES), lambda i: (i, 0)),     # x tiles (VMEM)
        ],
        out_specs=pl.BlockSpec((tile_r, LANES), lambda i: (i, 0)),
        compiler_params=pltpu.CompilerParams(
            dimension_semantics=("parallel",),
        ),
    )(params, x_slab)

    out = out_slab.reshape(-1)
    if N_pad != N:
        out = out[:N]
    return out.reshape(N, 1)


if __name__ == "__main__":
    key = jax.random.PRNGKey(0)
    N = 8          # batch of scalar samples
    H = 32         # n_hidden

    k_x, k_w1, k_b1, k_w2, k_b2 = jax.random.split(key, 5)
    x = jax.random.normal(k_x, (N, 1), dtype=jnp.float32)

    # Deterministic init mimicking nn.Linear's U(-1/sqrt(fan_in), 1/sqrt(fan_in))
    bound1 = 1.0 / jnp.sqrt(1.0)       # fan_in = 1
    w1 = jax.random.uniform(k_w1, (H, 1), minval=-bound1, maxval=bound1, dtype=jnp.float32)
    b1 = jax.random.uniform(k_b1, (H,), minval=-bound1, maxval=bound1, dtype=jnp.float32)
    bound2 = 1.0 / jnp.sqrt(float(H))  # fan_in = H
    w2 = jax.random.uniform(k_w2, (1, H), minval=-bound2, maxval=bound2, dtype=jnp.float32)
    b2 = jax.random.uniform(k_b2, (1,), minval=-bound2, maxval=bound2, dtype=jnp.float32)

    out = red_neuronal_forward(x, w1, b1, w2, b2)
    out = jax.block_until_ready(out)

    # Reference check in plain JAX (same math as the PyTorch forward).
    ref = jnp.tanh(x @ w1.T + b1) @ w2.T + b2
    assert out.shape == (N, 1)
    assert jnp.allclose(out, ref, atol=1e-5, rtol=1e-5)

    print("KERNEL_OK")
</pallas_src>

<mosaic_0001>
module attributes {stable_mosaic.version = 11 : i64} {
  func.func @_mlp_kernel(%arg0: i32, %arg1: memref<97xf32, #tpu.memory_space<smem>>, %arg2: memref<32x128xf32, #tpu.memory_space<vmem>>, %arg3: memref<32x128xf32, #tpu.memory_space<vmem>>) attributes {dimension_semantics = [#tpu.dimension_semantics<parallel>], iteration_bounds = array<i64: 1>, scalar_prefetch = 0 : i64, scratch_operands = 0 : i64, tpu.core_type = #tpu.core_type<tc>, window_params = [{transform_indices = @transform_0, window_bounds = array<i64: 97>}, {transform_indices = @transform_1, window_bounds = array<i64: 32, 128>}, {transform_indices = @transform_2, window_bounds = array<i64: 32, 128>}]} {
    %c96 = arith.constant 96 : index
    %0 = memref.load %arg1[%c96] : memref<97xf32, #tpu.memory_space<smem>>
    %c0_i32 = arith.constant 0 : i32
    %1 = tpu.assume_multiple %c0_i32, 32 : i32
    %2 = arith.index_cast %1 : i32 to index
    %c0 = arith.constant 0 : index
    %3 = vector.load %arg2[%2, %c0] : memref<32x128xf32, #tpu.memory_space<vmem>>, vector<32x128xf32>
    %4 = vector.broadcast %0 : f32 to vector<32x128xf32>
    %cst = arith.constant 0.000000e+00 : f32
    %5 = vector.broadcast %cst : f32 to vector<32x128xf32>
    %c64 = arith.constant 64 : index
    %6 = memref.load %arg1[%c64] : memref<97xf32, #tpu.memory_space<smem>>
    %c0_0 = arith.constant 0 : index
    %7 = memref.load %arg1[%c0_0] : memref<97xf32, #tpu.memory_space<smem>>
    %8 = vector.broadcast %7 : f32 to vector<32x128xf32>
    %9 = arith.mulf %3, %8 : vector<32x128xf32>
    %c32 = arith.constant 32 : index
    %10 = memref.load %arg1[%c32] : memref<97xf32, #tpu.memory_space<smem>>
    %11 = vector.broadcast %10 : f32 to vector<32x128xf32>
    %12 = arith.addf %9, %11 : vector<32x128xf32>
    %13 = math.tanh %12 : vector<32x128xf32>
    %14 = vector.broadcast %6 : f32 to vector<32x128xf32>
    %15 = arith.mulf %14, %13 : vector<32x128xf32>
    %16 = arith.addf %4, %15 : vector<32x128xf32>
    %c65 = arith.constant 65 : index
    %17 = memref.load %arg1[%c65] : memref<97xf32, #tpu.memory_space<smem>>
    %c1 = arith.constant 1 : index
    %18 = memref.load %arg1[%c1] : memref<97xf32, #tpu.memory_space<smem>>
    %19 = vector.broadcast %18 : f32 to vector<32x128xf32>
    %20 = arith.mulf %3, %19 : vector<32x128xf32>
    %c33 = arith.constant 33 : index
    %21 = memref.load %arg1[%c33] : memref<97xf32, #tpu.memory_space<smem>>
    %22 = vector.broadcast %21 : f32 to vector<32x128xf32>
    %23 = arith.addf %20, %22 : vector<32x128xf32>
    %24 = math.tanh %23 : vector<32x128xf32>
    %25 = vector.broadcast %17 : f32 to vector<32x128xf32>
    %26 = arith.mulf %25, %24 : vector<32x128xf32>
    %27 = arith.addf %5, %26 : vector<32x128xf32>
    %c66 = arith.constant 66 : index
    %28 = memref.load %arg1[%c66] : memref<97xf32, #tpu.memory_space<smem>>
    %c2 = arith.constant 2 : index
    %29 = memref.load %arg1[%c2] : memref<97xf32, #tpu.memory_space<smem>>
    %30 = vector.broadcast %29 : f32 to vector<32x128xf32>
    %31 = arith.mulf %3, %30 : vector<32x128xf32>
    %c34 = arith.constant 34 : index
    %32 = memref.load %arg1[%c34] : memref<97xf32, #tpu.memory_space<smem>>
    %33 = vector.broadcast %32 : f32 to vector<32x128xf32>
    %34 = arith.addf %31, %33 : vector<32x128xf32>
    %35 = math.tanh %34 : vector<32x128xf32>
    %36 = vector.broadcast %28 : f32 to vector<32x128xf32>
    %37 = arith.mulf %36, %35 : vector<32x128xf32>
    %38 = arith.addf %16, %37 : vector<32x128xf32>
    %c67 = arith.constant 67 : index
    %39 = memref.load %arg1[%c67] : memref<97xf32, #tpu.memory_space<smem>>
    %c3 = arith.constant 3 : index
    %40 = memref.load %arg1[%c3] : memref<97xf32, #tpu.memory_space<smem>>
    %41 = vector.broadcast %40 : f32 to vector<32x128xf32>
    %42 = arith.mulf %3, %41 : vector<32x128xf32>
    %c35 = arith.constant 35 : index
    %43 = memref.load %arg1[%c35] : memref<97xf32, #tpu.memory_space<smem>>
    %44 = vector.broadcast %43 : f32 to vector<32x128xf32>
    %45 = arith.addf %42, %44 : vector<32x128xf32>
    %46 = math.tanh %45 : vector<32x128xf32>
    %47 = vector.broadcast %39 : f32 to vector<32x128xf32>
    %48 = arith.mulf %47, %46 : vector<32x128xf32>
    %49 = arith.addf %27, %48 : vector<32x128xf32>
    %c68 = arith.constant 68 : index
    %50 = memref.load %arg1[%c68] : memref<97xf32, #tpu.memory_space<smem>>
    %c4 = arith.constant 4 : index
    %51 = memref.load %arg1[%c4] : memref<97xf32, #tpu.memory_space<smem>>
    %52 = vector.broadcast %51 : f32 to vector<32x128xf32>
    %53 = arith.mulf %3, %52 : vector<32x128xf32>
    %c36 = arith.constant 36 : index
    %54 = memref.load %arg1[%c36] : memref<97xf32, #tpu.memory_space<smem>>
    %55 = vector.broadcast %54 : f32 to vector<32x128xf32>
    %56 = arith.addf %53, %55 : vector<32x128xf32>
    %57 = math.tanh %56 : vector<32x128xf32>
    %58 = vector.broadcast %50 : f32 to vector<32x128xf32>
    %59 = arith.mulf %58, %57 : vector<32x128xf32>
    %60 = arith.addf %38, %59 : vector<32x128xf32>
    %c69 = arith.constant 69 : index
    %61 = memref.load %arg1[%c69] : memref<97xf32, #tpu.memory_space<smem>>
    %c5 = arith.constant 5 : index
    %62 = memref.load %arg1[%c5] : memref<97xf32, #tpu.memory_space<smem>>
    %63 = vector.broadcast %62 : f32 to vector<32x128xf32>
    %64 = arith.mulf %3, %63 : vector<32x128xf32>
    %c37 = arith.constant 37 : index
    %65 = memref.load %arg1[%c37] : memref<97xf32, #tpu.memory_space<smem>>
    %66 = vector.broadcast %65 : f32 to vector<32x128xf32>
    %67 = arith.addf %64, %66 : vector<32x128xf32>
    %68 = math.tanh %67 : vector<32x128xf32>
    %69 = vector.broadcast %61 : f32 to vector<32x128xf32>
    %70 = arith.mulf %69, %68 : vector<32x128xf32>
    %71 = arith.addf %49, %70 : vector<32x128xf32>
    %c70 = arith.constant 70 : index
    %72 = memref.load %arg1[%c70] : memref<97xf32, #tpu.memory_space<smem>>
    %c6 = arith.constant 6 : index
    %73 = memref.load %arg1[%c6] : memref<97xf32, #tpu.memory_space<smem>>
    %74 = vector.broadcast %73 : f32 to vector<32x128xf32>
    %75 = arith.mulf %3, %74 : vector<32x128xf32>
    %c38 = arith.constant 38 : index
    %76 = memref.load %arg1[%c38] : memref<97xf32, #tpu.memory_space<smem>>
    %77 = vector.broadcast %76 : f32 to vector<32x128xf32>
    %78 = arith.addf %75, %77 : vector<32x128xf32>
    %79 = math.tanh %78 : vector<32x128xf32>
    %80 = vector.broadcast %72 : f32 to vector<32x128xf32>
    %81 = arith.mulf %80, %79 : vector<32x128xf32>
    %82 = arith.addf %60, %81 : vector<32x128xf32>
    %c71 = arith.constant 71 : index
    %83 = memref.load %arg1[%c71] : memref<97xf32, #tpu.memory_space<smem>>
    %c7 = arith.constant 7 : index
    %84 = memref.load %arg1[%c7] : memref<97xf32, #tpu.memory_space<smem>>
    %85 = vector.broadcast %84 : f32 to vector<32x128xf32>
    %86 = arith.mulf %3, %85 : vector<32x128xf32>
    %c39 = arith.constant 39 : index
    %87 = memref.load %arg1[%c39] : memref<97xf32, #tpu.memory_space<smem>>
    %88 = vector.broadcast %87 : f32 to vector<32x128xf32>
    %89 = arith.addf %86, %88 : vector<32x128xf32>
    %90 = math.tanh %89 : vector<32x128xf32>
    %91 = vector.broadcast %83 : f32 to vector<32x128xf32>
    %92 = arith.mulf %91, %90 : vector<32x128xf32>
    %93 = arith.addf %71, %92 : vector<32x128xf32>
    %c72 = arith.constant 72 : index
    %94 = memref.load %arg1[%c72] : memref<97xf32, #tpu.memory_space<smem>>
    %c8 = arith.constant 8 : index
    %95 = memref.load %arg1[%c8] : memref<97xf32, #tpu.memory_space<smem>>
    %96 = vector.broadcast %95 : f32 to vector<32x128xf32>
    %97 = arith.mulf %3, %96 : vector<32x128xf32>
    %c40 = arith.constant 40 : index
    %98 = memref.load %arg1[%c40] : memref<97xf32, #tpu.memory_space<smem>>
    %99 = vector.broadcast %98 : f32 to vector<32x128xf32>
    %100 = arith.addf %97, %99 : vector<32x128xf32>
    %101 = math.tanh %100 : vector<32x128xf32>
    %102 = vector.broadcast %94 : f32 to vector<32x128xf32>
    %103 = arith.mulf %102, %101 : vector<32x128xf32>
    %104 = arith.addf %82, %103 : vector<32x128xf32>
    %c73 = arith.constant 73 : index
    %105 = memref.load %arg1[%c73] : memref<97xf32, #tpu.memory_space<smem>>
    %c9 = arith.constant 9 : index
    %106 = memref.load %arg1[%c9] : memref<97xf32, #tpu.memory_space<smem>>
    %107 = vector.broadcast %106 : f32 to vector<32x128xf32>
    %108 = arith.mulf %3, %107 : vector<32x128xf32>
    %c41 = arith.constant 41 : index
    %109 = memref.load %arg1[%c41] : memref<97xf32, #tpu.memory_space<smem>>
    %110 = vector.broadcast %109 : f32 to vector<32x128xf32>
    %111 = arith.addf %108, %110 : vector<32x128xf32>
    %112 = math.tanh %111 : vector<32x128xf32>
    %113 = vector.broadcast %105 : f32 to vector<32x128xf32>
    %114 = arith.mulf %113, %112 : vector<32x128xf32>
    %115 = arith.addf %93, %114 : vector<32x128xf32>
    %c74 = arith.constant 74 : index
    %116 = memref.load %arg1[%c74] : memref<97xf32, #tpu.memory_space<smem>>
    %c10 = arith.constant 10 : index
    %117 = memref.load %arg1[%c10] : memref<97xf32, #tpu.memory_space<smem>>
    %118 = vector.broadcast %117 : f32 to vector<32x128xf32>
    %119 = arith.mulf %3, %118 : vector<32x128xf32>
    %c42 = arith.constant 42 : index
    %120 = memref.load %arg1[%c42] : memref<97xf32, #tpu.memory_space<smem>>
    %121 = vector.broadcast %120 : f32 to vector<32x128xf32>
    %122 = arith.addf %119, %121 : vector<32x128xf32>
    %123 = math.tanh %122 : vector<32x128xf32>
    %124 = vector.broadcast %116 : f32 to vector<32x128xf32>
    %125 = arith.mulf %124, %123 : vector<32x128xf32>
    %126 = arith.addf %104, %125 : vector<32x128xf32>
    %c75 = arith.constant 75 : index
    %127 = memref.load %arg1[%c75] : memref<97xf32, #tpu.memory_space<smem>>
    %c11 = arith.constant 11 : index
    %128 = memref.load %arg1[%c11] : memref<97xf32, #tpu.memory_space<smem>>
    %129 = vector.broadcast %128 : f32 to vector<32x128xf32>
    %130 = arith.mulf %3, %129 : vector<32x128xf32>
    %c43 = arith.constant 43 : index
    %131 = memref.load %arg1[%c43] : memref<97xf32, #tpu.memory_space<smem>>
    %132 = vector.broadcast %131 : f32 to vector<32x128xf32>
    %133 = arith.addf %130, %132 : vector<32x128xf32>
    %134 = math.tanh %133 : vector<32x128xf32>
    %135 = vector.broadcast %127 : f32 to vector<32x128xf32>
    %136 = arith.mulf %135, %134 : vector<32x128xf32>
    %137 = arith.addf %115, %136 : vector<32x128xf32>
    %c76 = arith.constant 76 : index
    %138 = memref.load %arg1[%c76] : memref<97xf32, #tpu.memory_space<smem>>
    %c12 = arith.constant 12 : index
    %139 = memref.load %arg1[%c12] : memref<97xf32, #tpu.memory_space<smem>>
    %140 = vector.broadcast %139 : f32 to vector<32x128xf32>
    %141 = arith.mulf %3, %140 : vector<32x128xf32>
    %c44 = arith.constant 44 : index
    %142 = memref.load %arg1[%c44] : memref<97xf32, #tpu.memory_space<smem>>
    %143 = vector.broadcast %142 : f32 to vector<32x128xf32>
    %144 = arith.addf %141, %143 : vector<32x128xf32>
    %145 = math.tanh %144 : vector<32x128xf32>
    %146 = vector.broadcast %138 : f32 to vector<32x128xf32>
    %147 = arith.mulf %146, %145 : vector<32x128xf32>
    %148 = arith.addf %126, %147 : vector<32x128xf32>
    %c77 = arith.constant 77 : index
    %149 = memref.load %arg1[%c77] : memref<97xf32, #tpu.memory_space<smem>>
    %c13 = arith.constant 13 : index
    %150 = memref.load %arg1[%c13] : memref<97xf32, #tpu.memory_space<smem>>
    %151 = vector.broadcast %150 : f32 to vector<32x128xf32>
    %152 = arith.mulf %3, %151 : vector<32x128xf32>
    %c45 = arith.constant 45 : index
    %153 = memref.load %arg1[%c45] : memref<97xf32, #tpu.memory_space<smem>>
    %154 = vector.broadcast %153 : f32 to vector<32x128xf32>
    %155 = arith.addf %152, %154 : vector<32x128xf32>
    %156 = math.tanh %155 : vector<32x128xf32>
    %157 = vector.broadcast %149 : f32 to vector<32x128xf32>
    %158 = arith.mulf %157, %156 : vector<32x128xf32>
    %159 = arith.addf %137, %158 : vector<32x128xf32>
    %c78 = arith.constant 78 : index
    %160 = memref.load %arg1[%c78] : memref<97xf32, #tpu.memory_space<smem>>
    %c14 = arith.constant 14 : index
    %161 = memref.load %arg1[%c14] : memref<97xf32, #tpu.memory_space<smem>>
    %162 = vector.broadcast %161 : f32 to vector<32x128xf32>
    %163 = arith.mulf %3, %162 : vector<32x128xf32>
    %c46 = arith.constant 46 : index
    %164 = memref.load %arg1[%c46] : memref<97xf32, #tpu.memory_space<smem>>
    %165 = vector.broadcast %164 : f32 to vector<32x128xf32>
    %166 = arith.addf %163, %165 : vector<32x128xf32>
    %167 = math.tanh %166 : vector<32x128xf32>
    %168 = vector.broadcast %160 : f32 to vector<32x128xf32>
    %169 = arith.mulf %168, %167 : vector<32x128xf32>
    %170 = arith.addf %148, %169 : vector<32x128xf32>
    %c79 = arith.constant 79 : index
    %171 = memref.load %arg1[%c79] : memref<97xf32, #tpu.memory_space<smem>>
    %c15 = arith.constant 15 : index
    %172 = memref.load %arg1[%c15] : memref<97xf32, #tpu.memory_space<smem>>
    %173 = vector.broadcast %172 : f32 to vector<32x128xf32>
    %174 = arith.mulf %3, %173 : vector<32x128xf32>
    %c47 = arith.constant 47 : index
    %175 = memref.load %arg1[%c47] : memref<97xf32, #tpu.memory_space<smem>>
    %176 = vector.broadcast %175 : f32 to vector<32x128xf32>
    %177 = arith.addf %174, %176 : vector<32x128xf32>
    %178 = math.tanh %177 : vector<32x128xf32>
    %179 = vector.broadcast %171 : f32 to vector<32x128xf32>
    %180 = arith.mulf %179, %178 : vector<32x128xf32>
    %181 = arith.addf %159, %180 : vector<32x128xf32>
    %c80 = arith.constant 80 : index
    %182 = memref.load %arg1[%c80] : memref<97xf32, #tpu.memory_space<smem>>
    %c16 = arith.constant 16 : index
    %183 = memref.load %arg1[%c16] : memref<97xf32, #tpu.memory_space<smem>>
    %184 = vector.broadcast %183 : f32 to vector<32x128xf32>
    %185 = arith.mulf %3, %184 : vector<32x128xf32>
    %c48 = arith.constant 48 : index
    %186 = memref.load %arg1[%c48] : memref<97xf32, #tpu.memory_space<smem>>
    %187 = vector.broadcast %186 : f32 to vector<32x128xf32>
    %188 = arith.addf %185, %187 : vector<32x128xf32>
    %189 = math.tanh %188 : vector<32x128xf32>
    %190 = vector.broadcast %182 : f32 to vector<32x128xf32>
    %191 = arith.mulf %190, %189 : vector<32x128xf32>
    %192 = arith.addf %170, %191 : vector<32x128xf32>
    %c81 = arith.constant 81 : index
    %193 = memref.load %arg1[%c81] : memref<97xf32, #tpu.memory_space<smem>>
    %c17 = arith.constant 17 : index
    %194 = memref.load %arg1[%c17] : memref<97xf32, #tpu.memory_space<smem>>
    %195 = vector.broadcast %194 : f32 to vector<32x128xf32>
    %196 = arith.mulf %3, %195 : vector<32x128xf32>
    %c49 = arith.constant 49 : index
    %197 = memref.load %arg1[%c49] : memref<97xf32, #tpu.memory_space<smem>>
    %198 = vector.broadcast %197 : f32 to vector<32x128xf32>
    %199 = arith.addf %196, %198 : vector<32x128xf32>
    %200 = math.tanh %199 : vector<32x128xf32>
    %201 = vector.broadcast %193 : f32 to vector<32x128xf32>
    %202 = arith.mulf %201, %200 : vector<32x128xf32>
    %203 = arith.addf %181, %202 : vector<32x128xf32>
    %c82 = arith.constant 82 : index
    %204 = memref.load %arg1[%c82] : memref<97xf32, #tpu.memory_space<smem>>
    %c18 = arith.constant 18 : index
    %205 = memref.load %arg1[%c18] : memref<97xf32, #tpu.memory_space<smem>>
    %206 = vector.broadcast %205 : f32 to vector<32x128xf32>
    %207 = arith.mulf %3, %206 : vector<32x128xf32>
    %c50 = arith.constant 50 : index
    %208 = memref.load %arg1[%c50] : memref<97xf32, #tpu.memory_space<smem>>
    %209 = vector.broadcast %208 : f32 to vector<32x128xf32>
    %210 = arith.addf %207, %209 : vector<32x128xf32>
    %211 = math.tanh %210 : vector<32x128xf32>
    %212 = vector.broadcast %204 : f32 to vector<32x128xf32>
    %213 = arith.mulf %212, %211 : vector<32x128xf32>
    %214 = arith.addf %192, %213 : vector<32x128xf32>
    %c83 = arith.constant 83 : index
    %215 = memref.load %arg1[%c83] : memref<97xf32, #tpu.memory_space<smem>>
    %c19 = arith.constant 19 : index
    %216 = memref.load %arg1[%c19] : memref<97xf32, #tpu.memory_space<smem>>
    %217 = vector.broadcast %216 : f32 to vector<32x128xf32>
    %218 = arith.mulf %3, %217 : vector<32x128xf32>
    %c51 = arith.constant 51 : index
    %219 = memref.load %arg1[%c51] : memref<97xf32, #tpu.memory_space<smem>>
    %220 = vector.broadcast %219 : f32 to vector<32x128xf32>
    %221 = arith.addf %218, %220 : vector<32x128xf32>
    %222 = math.tanh %221 : vector<32x128xf32>
    %223 = vector.broadcast %215 : f32 to vector<32x128xf32>
    %224 = arith.mulf %223, %222 : vector<32x128xf32>
    %225 = arith.addf %203, %224 : vector<32x128xf32>
    %c84 = arith.constant 84 : index
    %226 = memref.load %arg1[%c84] : memref<97xf32, #tpu.memory_space<smem>>
    %c20 = arith.constant 20 : index
    %227 = memref.load %arg1[%c20] : memref<97xf32, #tpu.memory_space<smem>>
    %228 = vector.broadcast %227 : f32 to vector<32x128xf32>
    %229 = arith.mulf %3, %228 : vector<32x128xf32>
    %c52 = arith.constant 52 : index
    %230 = memref.load %arg1[%c52] : memref<97xf32, #tpu.memory_space<smem>>
    %231 = vector.broadcast %230 : f32 to vector<32x128xf32>
    %232 = arith.addf %229, %231 : vector<32x128xf32>
    %233 = math.tanh %232 : vector<32x128xf32>
    %234 = vector.broadcast %226 : f32 to vector<32x128xf32>
    %235 = arith.mulf %234, %233 : vector<32x128xf32>
    %236 = arith.addf %214, %235 : vector<32x128xf32>
    %c85 = arith.constant 85 : index
    %237 = memref.load %arg1[%c85] : memref<97xf32, #tpu.memory_space<smem>>
    %c21 = arith.constant 21 : index
    %238 = memref.load %arg1[%c21] : memref<97xf32, #tpu.memory_space<smem>>
    %239 = vector.broadcast %238 : f32 to vector<32x128xf32>
    %240 = arith.mulf %3, %239 : vector<32x128xf32>
    %c53 = arith.constant 53 : index
    %241 = memref.load %arg1[%c53] : memref<97xf32, #tpu.memory_space<smem>>
    %242 = vector.broadcast %241 : f32 to vector<32x128xf32>
    %243 = arith.addf %240, %242 : vector<32x128xf32>
    %244 = math.tanh %243 : vector<32x128xf32>
    %245 = vector.broadcast %237 : f32 to vector<32x128xf32>
    %246 = arith.mulf %245, %244 : vector<32x128xf32>
    %247 = arith.addf %225, %246 : vector<32x128xf32>
    %c86 = arith.constant 86 : index
    %248 = memref.load %arg1[%c86] : memref<97xf32, #tpu.memory_space<smem>>
    %c22 = arith.constant 22 : index
    %249 = memref.load %arg1[%c22] : memref<97xf32, #tpu.memory_space<smem>>
    %250 = vector.broadcast %249 : f32 to vector<32x128xf32>
    %251 = arith.mulf %3, %250 : vector<32x128xf32>
    %c54 = arith.constant 54 : index
    %252 = memref.load %arg1[%c54] : memref<97xf32, #tpu.memory_space<smem>>
    %253 = vector.broadcast %252 : f32 to vector<32x128xf32>
    %254 = arith.addf %251, %253 : vector<32x128xf32>
    %255 = math.tanh %254 : vector<32x128xf32>
    %256 = vector.broadcast %248 : f32 to vector<32x128xf32>
    %257 = arith.mulf %256, %255 : vector<32x128xf32>
    %258 = arith.addf %236, %257 : vector<32x128xf32>
    %c87 = arith.constant 87 : index
    %259 = memref.load %arg1[%c87] : memref<97xf32, #tpu.memory_space<smem>>
    %c23 = arith.constant 23 : index
    %260 = memref.load %arg1[%c23] : memref<97xf32, #tpu.memory_space<smem>>
    %261 = vector.broadcast %260 : f32 to vector<32x128xf32>
    %262 = arith.mulf %3, %261 : vector<32x128xf32>
    %c55 = arith.constant 55 : index
    %263 = memref.load %arg1[%c55] : memref<97xf32, #tpu.memory_space<smem>>
    %264 = vector.broadcast %263 : f32 to vector<32x128xf32>
    %265 = arith.addf %262, %264 : vector<32x128xf32>
    %266 = math.tanh %265 : vector<32x128xf32>
    %267 = vector.broadcast %259 : f32 to vector<32x128xf32>
    %268 = arith.mulf %267, %266 : vector<32x128xf32>
    %269 = arith.addf %247, %268 : vector<32x128xf32>
    %c88 = arith.constant 88 : index
    %270 = memref.load %arg1[%c88] : memref<97xf32, #tpu.memory_space<smem>>
    %c24 = arith.constant 24 : index
    %271 = memref.load %arg1[%c24] : memref<97xf32, #tpu.memory_space<smem>>
    %272 = vector.broadcast %271 : f32 to vector<32x128xf32>
    %273 = arith.mulf %3, %272 : vector<32x128xf32>
    %c56 = arith.constant 56 : index
    %274 = memref.load %arg1[%c56] : memref<97xf32, #tpu.memory_space<smem>>
    %275 = vector.broadcast %274 : f32 to vector<32x128xf32>
    %276 = arith.addf %273, %275 : vector<32x128xf32>
    %277 = math.tanh %276 : vector<32x128xf32>
    %278 = vector.broadcast %270 : f32 to vector<32x128xf32>
    %279 = arith.mulf %278, %277 : vector<32x128xf32>
    %280 = arith.addf %258, %279 : vector<32x128xf32>
    %c89 = arith.constant 89 : index
    %281 = memref.load %arg1[%c89] : memref<97xf32, #tpu.memory_space<smem>>
    %c25 = arith.constant 25 : index
    %282 = memref.load %arg1[%c25] : memref<97xf32, #tpu.memory_space<smem>>
    %283 = vector.broadcast %282 : f32 to vector<32x128xf32>
    %284 = arith.mulf %3, %283 : vector<32x128xf32>
    %c57 = arith.constant 57 : index
    %285 = memref.load %arg1[%c57] : memref<97xf32, #tpu.memory_space<smem>>
    %286 = vector.broadcast %285 : f32 to vector<32x128xf32>
    %287 = arith.addf %284, %286 : vector<32x128xf32>
    %288 = math.tanh %287 : vector<32x128xf32>
    %289 = vector.broadcast %281 : f32 to vector<32x128xf32>
    %290 = arith.mulf %289, %288 : vector<32x128xf32>
    %291 = arith.addf %269, %290 : vector<32x128xf32>
    %c90 = arith.constant 90 : index
    %292 = memref.load %arg1[%c90] : memref<97xf32, #tpu.memory_space<smem>>
    %c26 = arith.constant 26 : index
    %293 = memref.load %arg1[%c26] : memref<97xf32, #tpu.memory_space<smem>>
    %294 = vector.broadcast %293 : f32 to vector<32x128xf32>
    %295 = arith.mulf %3, %294 : vector<32x128xf32>
    %c58 = arith.constant 58 : index
    %296 = memref.load %arg1[%c58] : memref<97xf32, #tpu.memory_space<smem>>
    %297 = vector.broadcast %296 : f32 to vector<32x128xf32>
    %298 = arith.addf %295, %297 : vector<32x128xf32>
    %299 = math.tanh %298 : vector<32x128xf32>
    %300 = vector.broadcast %292 : f32 to vector<32x128xf32>
    %301 = arith.mulf %300, %299 : vector<32x128xf32>
    %302 = arith.addf %280, %301 : vector<32x128xf32>
    %c91 = arith.constant 91 : index
    %303 = memref.load %arg1[%c91] : memref<97xf32, #tpu.memory_space<smem>>
    %c27 = arith.constant 27 : index
    %304 = memref.load %arg1[%c27] : memref<97xf32, #tpu.memory_space<smem>>
    %305 = vector.broadcast %304 : f32 to vector<32x128xf32>
    %306 = arith.mulf %3, %305 : vector<32x128xf32>
    %c59 = arith.constant 59 : index
    %307 = memref.load %arg1[%c59] : memref<97xf32, #tpu.memory_space<smem>>
    %308 = vector.broadcast %307 : f32 to vector<32x128xf32>
    %309 = arith.addf %306, %308 : vector<32x128xf32>
    %310 = math.tanh %309 : vector<32x128xf32>
    %311 = vector.broadcast %303 : f32 to vector<32x128xf32>
    %312 = arith.mulf %311, %310 : vector<32x128xf32>
    %313 = arith.addf %291, %312 : vector<32x128xf32>
    %c92 = arith.constant 92 : index
    %314 = memref.load %arg1[%c92] : memref<97xf32, #tpu.memory_space<smem>>
    %c28 = arith.constant 28 : index
    %315 = memref.load %arg1[%c28] : memref<97xf32, #tpu.memory_space<smem>>
    %316 = vector.broadcast %315 : f32 to vector<32x128xf32>
    %317 = arith.mulf %3, %316 : vector<32x128xf32>
    %c60 = arith.constant 60 : index
    %318 = memref.load %arg1[%c60] : memref<97xf32, #tpu.memory_space<smem>>
    %319 = vector.broadcast %318 : f32 to vector<32x128xf32>
    %320 = arith.addf %317, %319 : vector<32x128xf32>
    %321 = math.tanh %320 : vector<32x128xf32>
    %322 = vector.broadcast %314 : f32 to vector<32x128xf32>
    %323 = arith.mulf %322, %321 : vector<32x128xf32>
    %324 = arith.addf %302, %323 : vector<32x128xf32>
    %c93 = arith.constant 93 : index
    %325 = memref.load %arg1[%c93] : memref<97xf32, #tpu.memory_space<smem>>
    %c29 = arith.constant 29 : index
    %326 = memref.load %arg1[%c29] : memref<97xf32, #tpu.memory_space<smem>>
    %327 = vector.broadcast %326 : f32 to vector<32x128xf32>
    %328 = arith.mulf %3, %327 : vector<32x128xf32>
    %c61 = arith.constant 61 : index
    %329 = memref.load %arg1[%c61] : memref<97xf32, #tpu.memory_space<smem>>
    %330 = vector.broadcast %329 : f32 to vector<32x128xf32>
    %331 = arith.addf %328, %330 : vector<32x128xf32>
    %332 = math.tanh %331 : vector<32x128xf32>
    %333 = vector.broadcast %325 : f32 to vector<32x128xf32>
    %334 = arith.mulf %333, %332 : vector<32x128xf32>
    %335 = arith.addf %313, %334 : vector<32x128xf32>
    %c94 = arith.constant 94 : index
    %336 = memref.load %arg1[%c94] : memref<97xf32, #tpu.memory_space<smem>>
    %c30 = arith.constant 30 : index
    %337 = memref.load %arg1[%c30] : memref<97xf32, #tpu.memory_space<smem>>
    %338 = vector.broadcast %337 : f32 to vector<32x128xf32>
    %339 = arith.mulf %3, %338 : vector<32x128xf32>
    %c62 = arith.constant 62 : index
    %340 = memref.load %arg1[%c62] : memref<97xf32, #tpu.memory_space<smem>>
    %341 = vector.broadcast %340 : f32 to vector<32x128xf32>
    %342 = arith.addf %339, %341 : vector<32x128xf32>
    %343 = math.tanh %342 : vector<32x128xf32>
    %344 = vector.broadcast %336 : f32 to vector<32x128xf32>
    %345 = arith.mulf %344, %343 : vector<32x128xf32>
    %346 = arith.addf %324, %345 : vector<32x128xf32>
    %c95 = arith.constant 95 : index
    %347 = memref.load %arg1[%c95] : memref<97xf32, #tpu.memory_space<smem>>
    %c31 = arith.constant 31 : index
    %348 = memref.load %arg1[%c31] : memref<97xf32, #tpu.memory_space<smem>>
    %349 = vector.broadcast %348 : f32 to vector<32x128xf32>
    %350 = arith.mulf %3, %349 : vector<32x128xf32>
    %c63 = arith.constant 63 : index
    %351 = memref.load %arg1[%c63] : memref<97xf32, #tpu.memory_space<smem>>
    %352 = vector.broadcast %351 : f32 to vector<32x128xf32>
    %353 = arith.addf %350, %352 : vector<32x128xf32>
    %354 = math.tanh %353 : vector<32x128xf32>
    %355 = vector.broadcast %347 : f32 to vector<32x128xf32>
    %356 = arith.mulf %355, %354 : vector<32x128xf32>
    %357 = arith.addf %335, %356 : vector<32x128xf32>
    %358 = arith.addf %346, %357 : vector<32x128xf32>
    %359 = arith.index_cast %1 : i32 to index
    %c0_1 = arith.constant 0 : index
    %360 = vector.load %arg3[%359, %c0_1] : memref<32x128xf32, #tpu.memory_space<vmem>>, vector<32x128xf32>
    tpu.vector_store %arg3[%359, %c0_1], %358 {strides = array<i32>} : memref<32x128xf32, #tpu.memory_space<vmem>>, vector<32x128xf32>,
    return
  }
  func.func @transform_0(%arg0: i32) -> i32 {
    %c0_i32 = arith.constant 0 : i32
    %c0_i32_0 = arith.constant 0 : i32
    return %c0_i32 : i32
  }
  func.func @transform_1(%arg0: i32) -> (i32, i32) {
    %c0_i32 = arith.constant 0 : i32
    %c0_i32_0 = arith.constant 0 : i32
    return %arg0, %c0_i32 : i32, i32
  }
  func.func @transform_2(%arg0: i32) -> (i32, i32) {
    %c0_i32 = arith.constant 0 : i32
    %c0_i32_0 = arith.constant 0 : i32
    return %arg0, %c0_i32 : i32, i32
  }
}

</mosaic_0001>

<bundles_post_ra>
// kernel: tpu_custom_call.1
= control target key start
LH: loop header
LB: loop body
LE: loop exit
PB: predicated region body
PF: predicated region fallthrough
CT: control target
= control target key end

     0   :  { %7 = vsyncpa [#allocation5], 0  ;;  %s1990_s0 = inlined_call_operand.hbm [shape: f32[97], index: 0, kind: input, shape index: {}]   ;;  %s1991_s1 = inlined_call_operand.hbm [shape: f32[32,128], index: 1, kind: input, shape index: {}]   ;;  %s1992_s2 = inlined_call_operand.hbm [shape: f32[32,128], index: 2, kind: output, shape index: {}]  }
   0x1   :  { %8 = vsyncpa [#allocation3], 0 }
   0x2   :  { %9 = vsyncpa [#allocation4], 0  ;;  %s1262_s11 = scalar_lea.hbm %s1990_s0, 16 }
   0x3   :  { %p1263_p0 = scmp.ne.s32.totalorder %s1990_s0, %s1262_s11  ;;  %p1266_p1 = scmp.lt.u32.totalorder %s1262_s11, %s1990_s0 }
   0x5   :  { %p1268_p2 = pnand %p1266_p1, %p1263_p0 }
   0x7   :  { %1271 = shalt.err (!%p1268_p2)
}
   0x8   :  { %s1322_s16 = smov [#allocation2]   ;;  %s1323_s19 = smov [#allocation6]  }
   0x9   :  { %17 = dma.hbm_to_smem %s1990_s0, 16, %s1322_s16, [#allocation5]  }
   0xa   :  { %s23_s20 = sshll.u32 %s1323_s19, 4  ;;  %s1272_s23 = scalar_lea.hbm %s1991_s1, 512  ;;  %s24_s20 = int_to_ptr.vmem [resolvable:$true] %s23_s20 }
   0xb   :  { %p1273_p3 = scmp.ne.s32.totalorder %s1991_s1, %s1272_s23  ;;  %p1276_p4 = scmp.lt.u32.totalorder %s1272_s23, %s1991_s1 }
   0xd   :  { %p1278_p5 = pnand %p1276_p4, %p1273_p3 }
   0xf   :  { %1281 = shalt.err (!%p1278_p5)
}
  0x10   :  { %s1282_s28 = scalar_lea.vmem %s24_s20, 512  ;;  %p1287_p7 = scmp.lt.s32.totalorder %s24_s20, %s24_s20 }
  0x11   :  { %p1283_p6 = scmp.ne.s32.totalorder %s24_s20, %s1282_s28  ;;  %p1288_p8 = scmp.lt.s32.totalorder %s1282_s28, %s1282_s28 }
  0x13   :  { %p1289_p9 = por %p1288_p8, %p1287_p7 }
  0x15   :  { %p1290_p10 = pnand %p1289_p9, %p1283_p6 }
  0x17   :  { %1293 = shalt.err (!%p1290_p10)
}
  0x18   :  { %s1324_s0 = smov 128   ;;  %s1325_s29 = smov 8  }
  0x19   :  { %29 = dma.hbm_to_vmem [thread:$0]  %s1991_s1, 512, %s24_s20, [#allocation3], %s1324_s0, %s1324_s0, %s1325_s29  }
  0x1a   :  { %1316 = dma.done.wait [#allocation5], 16  }
  0x1b   :  { %1317 = vsyncadd [#allocation5], 4294967280 }
  0x1c   :  { %1318 = dma.done.wait [#allocation3], 512  }
  0x1d   :  { %1319 = vsyncadd [#allocation3], 4294966784 }
  0x1e   :  { %36 = sfence }
  0x1f   :  { %s44_s4 = sld [smem:[#allocation2]]  ;;  %s905_s6 = sld [smem:[#allocation2 + $0x1]]  ;;  %v1369_v0 = vld [vmem:[#allocation6] sm:$0xff]  ;;  %v1371_v2 = vld [vmem:[#allocation6 + $0x8] sm:$0xff]  ;;  %v1373_v3 = vld [vmem:[#allocation6 + $0x10] sm:$0xff] }
  0x20   :  { %s903_s5 = sld [smem:[#allocation2 + $0x20]]  ;;  %s906_s7 = sld [smem:[#allocation2 + $0x21]]  ;;  %v1375_v4 = vld [vmem:[#allocation6 + $0x18] sm:$0xff] }
  0x21   :  { %s908_s8 = sld [smem:[#allocation2 + $0x2]]  ;;  %s911_s9 = sld [smem:[#allocation2 + $0x3]] }
  0x22   :  { %s909_s1 = sld [smem:[#allocation2 + $0x22]]  ;;  %s1383_s10 = sld [smem:[#allocation2 + $0x23]] }
  0x23   :  { %s1386_s11 = sld [smem:[#allocation2 + $0x4]]  ;;  %s1388_s12 = sld [smem:[#allocation2 + $0x60]] }
  0x24   :  { %s1391_s13 = sld [smem:[#allocation2 + $0x40]]  ;;  %s1396_s14 = sld [smem:[#allocation2 + $0x24]] }
  0x25   :  { %v45_v1 = vstv %s44_s4  ;;  %v71_v8 = vstv %s905_s6  ;;  %s1398_s15 = sld [smem:[#allocation2 + $0x5]]  ;;  %s1400_s16 = sld [smem:[#allocation2 + $0x41]] }
  0x26   :  { %v46_v5 = vmul.f32 %v45_v1, %v1369_v0  ;;  %v47_v6 = vmul.f32 %v45_v1, %v1371_v2  ;;  %v51_v7 = vstv %s903_s5  ;;  %v48_v9 = vmul.f32 %v45_v1, %v1373_v3  ;;  %s1402_s17 = sld [smem:[#allocation2 + $0x42]]  ;;  %s1405_s18 = sld [smem:[#allocation2 + $0x43]] }
  0x27   :  { %v49_v10 = vmul.f32 %v45_v1, %v1375_v4  ;;  %v72_v12 = vmul.f32 %v71_v8, %v1369_v0  ;;  %v73_v14 = vmul.f32 %v71_v8, %v1371_v2  ;;  %v77_v15 = vstv %s906_s7  ;;  %s1412_s19 = sld [smem:[#allocation2 + $0x25]]  ;;  %s1414_s20 = sld [smem:[#allocation2 + $0x6]] }
  0x28   :  { %v52_v11 = vadd.f32 %v51_v7, %v46_v5  ;;  %v53_v13 = vadd.f32 %v51_v7, %v47_v6  ;;  %v97_v16 = vstv %s908_s8  ;;  %v54_v17 = vadd.f32 %v51_v7, %v48_v9  ;;  %s1419_s21 = sld [smem:[#allocation2 + $0x44]]  ;;  %s1427_s22 = sld [smem:[#allocation2 + $0x26]] }
  0x29   :  { %v74_v18 = vmul.f32 %v71_v8, %v1373_v3  ;;  %v55_v19 = vadd.f32 %v51_v7, %v49_v10  ;;  %v75_v20 = vmul.f32 %v71_v8, %v1375_v4  ;;  %v78_v21 = vadd.f32 %v77_v15, %v72_v12  ;;  %s1444_s23 = sld [smem:[#allocation2 + $0x7]]  ;;  %s1458_s25 = sld [smem:[#allocation2 + $0x45]] }
  0x2a   :  { %1002 = vtanh.f32 %v52_v11  ;;  %v98_v22 = vmul.f32 %v97_v16, %v1369_v0  ;;  %v103_v23 = vstv %s909_s1  ;;  %v79_v24 = vadd.f32 %v77_v15, %v73_v14  ;;  %s1454_s24 = sld [smem:[#allocation2 + $0x27]]  ;;  %s1465_s26 = sld [smem:[#allocation2 + $0x8]] }
  0x2b   :  { %1004 = vtanh.f32 %v53_v13  ;;  %v99_v25 = vmul.f32 %v97_v16, %v1371_v2  ;;  %v123_v26 = vstv %s911_s9  ;;  %v80_v27 = vadd.f32 %v77_v15, %v74_v18  ;;  %s1476_s27 = sld [smem:[#allocation2 + $0x46]]  ;;  %s1479_s28 = sld [smem:[#allocation2 + $0x28]] }
  0x2c   :  { %1006 = vtanh.f32 %v54_v17  ;;  %v100_v28 = vmul.f32 %v97_v16, %v1373_v3  ;;  %v81_v29 = vadd.f32 %v77_v15, %v75_v20  ;;  %v101_v30 = vmul.f32 %v97_v16, %v1375_v4  ;;  %s1488_s30 = sld [smem:[#allocation2 + $0x9]]  ;;  %s1491_s3 = sld [smem:[#allocation2 + $0x47]] }
  0x2d   :  { %1008 = vtanh.f32 %v55_v19  ;;  %v104_v31 = vadd.f32 %v103_v23, %v98_v22  ;;  %v124_v32 = vmul.f32 %v123_v26, %v1369_v0  ;;  %v105_v33 = vadd.f32 %v103_v23, %v99_v25  ;;  %s1499_s4 = sld [smem:[#allocation2 + $0x29]]  ;;  %s1504_s5 = sld [smem:[#allocation2 + $0xa]] }
  0x2e   :  { %1010 = vtanh.f32 %v78_v21  ;;  %v125_v34 = vmul.f32 %v123_v26, %v1371_v2  ;;  %v129_v35 = vstv %s1383_s10  ;;  %v106_v36 = vadd.f32 %v103_v23, %v100_v28  ;;  %s1507_s6 = sld [smem:[#allocation2 + $0x48]]  ;;  %s1512_s7 = sld [smem:[#allocation2 + $0x2a]] }
  0x2f   :  { %1012 = vtanh.f32 %v79_v24  ;;  %v126_v37 = vmul.f32 %v123_v26, %v1373_v3  ;;  %v149_v38 = vstv %s1386_s11  ;;  %v1417_v39 = vstv %s1388_s12  ;;  %s1516_s8 = sld [smem:[#allocation2 + $0x49]]  ;;  %s1518_s1 = sld [smem:[#allocation2 + $0xb]] }
  0x30   :  { %1014 = vtanh.f32 %v80_v27  ;;  %v107_v40 = vadd.f32 %v103_v23, %v101_v30  ;;  %v60_v41 = vstv %s1391_s13  ;;  %v127_v42 = vmul.f32 %v123_v26, %v1375_v4  ;;  %s1521_s9 = sld [smem:[#allocation2 + $0x4a]]  ;;  %s1528_s10 = sld [smem:[#allocation2 + $0x2b]] }
  0x31   :  { %1016 = vtanh.f32 %v81_v29  ;;  %v130_v43 = vadd.f32 %v129_v35, %v124_v32  ;;  %v131_v44 = vadd.f32 %v129_v35, %v125_v34  ;;  %v150_v45 = vmul.f32 %v149_v38, %v1369_v0  ;;  %s1530_s11 = sld [smem:[#allocation2 + $0xc]]  ;;  %s1557_s13 = sld [smem:[#allocation2 + $0xd]] }
  0x32   :  { %1018 = vtanh.f32 %v104_v31  ;;  %v151_v46 = vmul.f32 %v149_v38, %v1371_v2  ;;  %v132_v48 = vadd.f32 %v129_v35, %v126_v37  ;;  %v155_v49 = vstv %s1396_s14  ;;  %s1550_s12 = sld [smem:[#allocation2 + $0x2c]]  ;;  %s1569_s14 = sld [smem:[#allocation2 + $0x2d]] }
  0x33   :  { %1020 = vtanh.f32 %v105_v33  ;;  %v175_v50 = vstv %s1398_s15  ;;  %v1430_v52 = vstv %s1400_s16  ;;  %v1433_v53 = vstv %s1402_s17  ;;  %s1574_s15 = sld [smem:[#allocation2 + $0xe]]  ;;  %s1579_s16 = sld [smem:[#allocation2 + $0x4b]] }
  0x34   :  { %v1003_v47 = vpop.eup %1002  ;;  %1022 = vtanh.f32 %v106_v36  ;;  %v152_v54 = vmul.f32 %v149_v38, %v1373_v3  ;;  %v133_v56 = vadd.f32 %v129_v35, %v127_v42  ;;  %v1437_v57 = vstv %s1405_s18  ;;  %s1588_s17 = sld [smem:[#allocation2 + $0x2e]]  ;;  %s1603_s18 = sld [smem:[#allocation2 + $0xf]] }
  0x35   :  { %v1005_v51 = vpop.eup %1004  ;;  %1024 = vtanh.f32 %v107_v40  ;;  %v153_v58 = vmul.f32 %v149_v38, %v1375_v4  ;;  %v156_v60 = vadd.f32 %v155_v49, %v150_v45  ;;  %v157_v61 = vadd.f32 %v155_v49, %v151_v46 }
  0x36   :  { %v1007_v55 = vpop.eup %1006  ;;  %1026 = vtanh.f32 %v130_v43  ;;  %v176_v62 = vmul.f32 %v175_v50, %v1369_v0  ;;  %v177_v1 = vmul.f32 %v175_v50, %v1371_v2  ;;  %v181_v5 = vstv %s1412_s19  ;;  %s1611_s19 = sld [smem:[#allocation2 + $0x4c]] }
  0x37   :  { %v1009_v59 = vpop.eup %1008  ;;  %1028 = vtanh.f32 %v131_v44  ;;  %v201_v6 = vstv %s1414_s20  ;;  %v61_v8 = vmul.f32 %v1003_v47, %v60_v41  ;;  %v158_v9 = vadd.f32 %v155_v49, %v152_v54  ;;  %s1620_s20 = sld [smem:[#allocation2 + $0x2f]] }
  0x38   :  { %v1011_v63 = vpop.eup %1010  ;;  %1030 = vtanh.f32 %v132_v48  ;;  %v1447_v10 = vstv %s1419_s21  ;;  %v178_v11 = vmul.f32 %v175_v50, %v1373_v3  ;;  %v62_v13 = vmul.f32 %v1005_v51, %v60_v41  ;;  %s1629_s21 = sld [smem:[#allocation2 + $0x4d]] }
  0x39   :  { %v1013_v7 = vpop.eup %1012  ;;  %1032 = vtanh.f32 %v133_v56  ;;  %v159_v14 = vadd.f32 %v155_v49, %v153_v58  ;;  %v179_v15 = vmul.f32 %v175_v50, %v1375_v4  ;;  %v63_v17 = vmul.f32 %v1007_v55, %v60_v41 }
  0x3a   :  { %v1015_v12 = vpop.eup %1014  ;;  %1034 = vtanh.f32 %v156_v60  ;;  %v182_v18 = vadd.f32 %v181_v5, %v176_v62  ;;  %v202_v19 = vmul.f32 %v201_v6, %v1369_v0  ;;  %v183_v21 = vadd.f32 %v181_v5, %v177_v1 }
  0x3b   :  { %v1017_v16 = vpop.eup %1016  ;;  %1036 = vtanh.f32 %v157_v61  ;;  %v203_v22 = vmul.f32 %v201_v6, %v1371_v2  ;;  %v207_v23 = vstv %s1427_s22  ;;  %v64_v25 = vmul.f32 %v1009_v59, %v60_v41  ;;  %s1633_s22 = sld [smem:[#allocation2 + $0x10]] }
  0x3c   :  { %v1019_v20 = vpop.eup %1018  ;;  %1038 = vtanh.f32 %v158_v9  ;;  %v184_v26 = vadd.f32 %v181_v5, %v178_v11  ;;  %v204_v27 = vmul.f32 %v201_v6, %v1373_v3  ;;  %v65_v29 = vadd.f32 %v61_v8, %v1417_v39 }
  0x3d   :  { %v1021_v24 = vpop.eup %1020  ;;  %1040 = vtanh.f32 %v159_v14  ;;  %v185_v30 = vadd.f32 %v181_v5, %v179_v15  ;;  %v205_v31 = vmul.f32 %v201_v6, %v1375_v4  ;;  %v66_v33 = vadd.f32 %v62_v13, %v1417_v39 }
  0x3e   :  { %v1023_v28 = vpop.eup %1022  ;;  %v67_v34 = vadd.f32 %v63_v17, %v1417_v39  ;;  %1042 = vtanh.f32 %v182_v18  ;;  %v208_v35 = vadd.f32 %v207_v23, %v202_v19  ;;  %v87_v37 = vmul.f32 %v1011_v63, %v1430_v52 }
  0x3f   :  { %v1025_v32 = vpop.eup %1024  ;;  %1044 = vtanh.f32 %v183_v21  ;;  %v209_v38 = vadd.f32 %v207_v23, %v203_v22  ;;  %v227_v40 = vstv %s1444_s23  ;;  %v68_v42 = vadd.f32 %v64_v25, %v1417_v39  ;;  %s1640_s23 = sld [smem:[#allocation2 + $0x4e]] }
  0x40   :  { %v1027_v36 = vpop.eup %1026  ;;  %v88_v43 = vmul.f32 %v1013_v7, %v1430_v52  ;;  %1046 = vtanh.f32 %v184_v26  ;;  %v210_v44 = vadd.f32 %v207_v23, %v204_v27  ;;  %v89_v46 = vmul.f32 %v1015_v12, %v1430_v52 }
  0x41   :  { %v1029_v41 = vpop.eup %1028  ;;  %v113_v47 = vmul.f32 %v1019_v20, %v1433_v53  ;;  %1048 = vtanh.f32 %v185_v30  ;;  %v211_v48 = vadd.f32 %v207_v23, %v205_v31  ;;  %v114_v49 = vmul.f32 %v1021_v24, %v1433_v53 }
  0x42   :  { %v1031_v45 = vpop.eup %1030  ;;  %v115_v50 = vmul.f32 %v1023_v28, %v1433_v53  ;;  %1050 = vtanh.f32 %v208_v35  ;;  %v228_v39 = vmul.f32 %v227_v40, %v1369_v0  ;;  %v116_v54 = vmul.f32 %v1025_v32, %v1433_v53 }
  0x43   :  { %v1033_v51 = vpop.eup %1032  ;;  %v139_v55 = vmul.f32 %v1027_v36, %v1437_v57  ;;  %1052 = vtanh.f32 %v209_v38  ;;  %v233_v56 = vstv %s1454_s24  ;;  %v140_v59 = vmul.f32 %v1029_v41, %v1437_v57  ;;  %s1648_s24 = sld [smem:[#allocation2 + $0x30]] }
  0x44   :  { %v1035_v58 = vpop.eup %1034  ;;  %v141_v60 = vmul.f32 %v1031_v45, %v1437_v57  ;;  %1054 = vtanh.f32 %v210_v44  ;;  %v229_v61 = vmul.f32 %v227_v40, %v1371_v2  ;;  %v90_v53 = vmul.f32 %v1017_v16, %v1430_v52 }
  0x45   :  { %v1037_v62 = vpop.eup %1036  ;;  %v190_v63 = vstv %s1458_s25  ;;  %1056 = vtanh.f32 %v211_v48  ;;  %v230_v1 = vmul.f32 %v227_v40, %v1373_v3  ;;  %v117_v6 = vadd.f32 %v113_v47, %v65_v29  ;;  %s1655_s25 = sld [smem:[#allocation2 + $0x11]] }
  0x46   :  { %v1039_v5 = vpop.eup %1038  ;;  %v118_v7 = vadd.f32 %v114_v49, %v66_v33  ;;  %v231_v8 = vmul.f32 %v227_v40, %v1375_v4  ;;  %v234_v9 = vadd.f32 %v233_v56, %v228_v39  ;;  %v119_v12 = vadd.f32 %v115_v50, %v67_v34 }
  0x47   :  { %v1041_v11 = vpop.eup %1040  ;;  %v120_v13 = vadd.f32 %v116_v54, %v68_v42  ;;  %v142_v14 = vmul.f32 %v1033_v51, %v1437_v57  ;;  %v253_v52 = vstv %s1465_s26  ;;  %v143_v16 = vadd.f32 %v139_v55, %v87_v37  ;;  %s1658_s26 = sld [smem:[#allocation2 + $0x4f]] }
  0x48   :  { %v1043_v15 = vpop.eup %1042  ;;  %v144_v17 = vadd.f32 %v140_v59, %v88_v43  ;;  %v145_v18 = vadd.f32 %v141_v60, %v89_v46  ;;  %v235_v19 = vadd.f32 %v233_v56, %v229_v61  ;;  %v165_v21 = vmul.f32 %v1035_v58, %v1447_v10 }
  0x49   :  { %v1045_v20 = vpop.eup %1044  ;;  %v166_v22 = vmul.f32 %v1037_v62, %v1447_v10  ;;  %v167_v23 = vmul.f32 %v1039_v5, %v1447_v10  ;;  %v236_v24 = vadd.f32 %v233_v56, %v230_v1  ;;  %v168_v57 = vmul.f32 %v1041_v11, %v1447_v10 }
  0x4a   :  { %v1047_v25 = vpop.eup %1046  ;;  %v237_v26 = vadd.f32 %v233_v56, %v231_v8  ;;  %1058 = vtanh.f32 %v234_v9  ;;  %v254_v27 = vmul.f32 %v253_v52, %v1369_v0  ;;  %v146_v29 = vadd.f32 %v142_v14, %v90_v53 }
  0x4b   :  { %v1049_v28 = vpop.eup %1048  ;;  %v216_v30 = vstv %s1476_s27  ;;  %v255_v31 = vmul.f32 %v253_v52, %v1371_v2  ;;  %v259_v32 = vstv %s1479_s28  ;;  %v191_v34 = vmul.f32 %v1043_v15, %v190_v63  ;;  %s1663_s27 = sld [smem:[#allocation2 + $0x31]]  ;;  %s1666_s28 = sld [smem:[#allocation2 + $0x12]] }
  0x4c   :  { %v1051_v33 = vpop.eup %1050  ;;  %v192_v35 = vmul.f32 %v1045_v20, %v190_v63  ;;  %1060 = vtanh.f32 %v235_v19  ;;  %v256_v10 = vmul.f32 %v253_v52, %v1373_v3  ;;  %v169_v37 = vadd.f32 %v165_v21, %v117_v6 }
  0x4d   :  { %v1053_v36 = vpop.eup %1052  ;;  %v170_v38 = vadd.f32 %v166_v22, %v118_v7  ;;  %v171_v40 = vadd.f32 %v167_v23, %v119_v12  ;;  %1062 = vtanh.f32 %v236_v24  ;;  %v172_v42 = vadd.f32 %v168_v57, %v120_v13 }
  0x4e   :  { %v1055_v41 = vpop.eup %1054  ;;  %1064 = vtanh.f32 %v237_v26  ;;  %v260_v43 = vadd.f32 %v259_v32, %v254_v27  ;;  %v279_v44 = vstv %s1488_s30  ;;  %v193_v46 = vmul.f32 %v1047_v25, %v190_v63  ;;  %s1668_s30 = sld [smem:[#allocation2 + $0x50]] }
  0x4f   :  { %v1057_v45 = vpop.eup %1056  ;;  %v242_v47 = vstv %s1491_s3  ;;  %v257_v48 = vmul.f32 %v253_v52, %v1375_v4  ;;  %v261_v49 = vadd.f32 %v259_v32, %v255_v31  ;;  %v194_v50 = vmul.f32 %v1049_v28, %v190_v63  ;;  %s1680_s3 = sld [smem:[#allocation2 + $0x32]] }
  0x50   :  { %v195_v39 = vadd.f32 %v191_v34, %v143_v16  ;;  %v1514_v51 = vadd.f32 %v192_v35, %v144_v17  ;;  %v262_v54 = vadd.f32 %v259_v32, %v256_v10  ;;  %v217_v55 = vmul.f32 %v1051_v33, %v216_v30 }
  0x51   :  { %v218_v56 = vmul.f32 %v1053_v36, %v216_v30  ;;  %v219_v58 = vmul.f32 %v1055_v41, %v216_v30  ;;  %v280_v59 = vmul.f32 %v279_v44, %v1369_v0  ;;  %v220_v60 = vmul.f32 %v1057_v45, %v216_v30 }
  0x52   :  { %1066 = vtanh.f32 %v260_v43  ;;  %v281_v61 = vmul.f32 %v279_v44, %v1371_v2  ;;  %v285_v62 = vstv %s1499_s4  ;;  %v263_v53 = vadd.f32 %v259_v32, %v257_v48  ;;  %s1682_s4 = sld [smem:[#allocation2 + $0x13]] }
  0x53   :  { %1068 = vtanh.f32 %v261_v49  ;;  %v282_v63 = vmul.f32 %v279_v44, %v1373_v3  ;;  %v305_v1 = vstv %s1504_s5  ;;  %v197_v6 = vadd.f32 %v193_v46, %v145_v18  ;;  %s1686_s5 = sld [smem:[#allocation2 + $0x51]] }
  0x54   :  { %v1059_v5 = vpop.eup %1058  ;;  %v198_v7 = vadd.f32 %v194_v50, %v146_v29  ;;  %1070 = vtanh.f32 %v262_v54  ;;  %v283_v8 = vmul.f32 %v279_v44, %v1375_v4  ;;  %v1532_v9 = vadd.f32 %v217_v55, %v169_v37 }
  0x55   :  { %v1534_v11 = vadd.f32 %v218_v56, %v170_v38  ;;  %v1537_v12 = vstv %s1507_s6  ;;  %v286_v13 = vadd.f32 %v285_v62, %v280_v59  ;;  %v1539_v52 = vadd.f32 %v219_v58, %v171_v40  ;;  %s1696_s6 = sld [smem:[#allocation2 + $0x33]] }
  0x56   :  { %v1061_v14 = vpop.eup %1060  ;;  %v1541_v15 = vadd.f32 %v220_v60, %v172_v42  ;;  %v287_v16 = vadd.f32 %v285_v62, %v281_v61  ;;  %v306_v17 = vmul.f32 %v305_v1, %v1369_v0  ;;  %v243_v19 = vmul.f32 %v1059_v5, %v242_v47 }
  0x57   :  { %v1063_v18 = vpop.eup %1062  ;;  %1072 = vtanh.f32 %v263_v53  ;;  %v288_v20 = vadd.f32 %v285_v62, %v282_v63  ;;  %v311_v21 = vstv %s1512_s7  ;;  %v289_v23 = vadd.f32 %v285_v62, %v283_v8  ;;  %s1698_s7 = sld [smem:[#allocation2 + $0x14]] }
  0x58   :  { %v1065_v22 = vpop.eup %1064  ;;  %v1546_v24 = vstv %s1516_s8  ;;  %v307_v25 = vmul.f32 %v305_v1, %v1371_v2  ;;  %v331_v57 = vstv %s1518_s1  ;;  %v244_v26 = vmul.f32 %v1061_v14, %v242_v47  ;;  %s1717_s8 = sld [smem:[#allocation2 + $0x34]]  ;;  %s1730_s1 = sld [smem:[#allocation2 + $0x15]] }
  0x59   :  { %1074 = vtanh.f32 %v286_v13  ;;  %v308_v27 = vmul.f32 %v305_v1, %v1373_v3  ;;  %v1554_v28 = vstv %s1521_s9  ;;  %v245_v29 = vmul.f32 %v1063_v18, %v242_v47  ;;  %s1744_s9 = sld [smem:[#allocation2 + $0x52]] }
  0x5a   :  { %1076 = vtanh.f32 %v287_v16  ;;  %v309_v30 = vmul.f32 %v305_v1, %v1375_v4  ;;  %v312_v31 = vadd.f32 %v311_v21, %v306_v17  ;;  %v246_v32 = vmul.f32 %v1065_v22, %v242_v47 }
  0x5b   :  { %v1559_v33 = vadd.f32 %v243_v19, %v195_v39  ;;  %1078 = vtanh.f32 %v288_v20  ;;  %v332_v34 = vmul.f32 %v331_v57, %v1369_v0  ;;  %v313_v10 = vadd.f32 %v311_v21, %v307_v25 }
  0x5c   :  { %v1067_v35 = vpop.eup %1066  ;;  %v333_v36 = vmul.f32 %v331_v57, %v1371_v2  ;;  %v337_v37 = vstv %s1528_s10  ;;  %v357_v38 = vstv %s1530_s11  ;;  %v1566_v41 = vadd.f32 %v244_v26, %v1514_v51  ;;  %s1749_s10 = sld [smem:[#allocation2 + $0x35]]  ;;  %s1755_s11 = sld [smem:[#allocation2 + $0x16]] }
  0x5d   :  { %v1069_v40 = vpop.eup %1068  ;;  %1080 = vtanh.f32 %v289_v23  ;;  %v314_v42 = vadd.f32 %v311_v21, %v308_v27  ;;  %v334_v43 = vmul.f32 %v331_v57, %v1373_v3  ;;  %v1571_v45 = vadd.f32 %v245_v29, %v197_v6 }
  0x5e   :  { %v1071_v44 = vpop.eup %1070  ;;  %v315_v46 = vadd.f32 %v311_v21, %v309_v30  ;;  %1082 = vtanh.f32 %v312_v31  ;;  %v335_v47 = vmul.f32 %v331_v57, %v1375_v4  ;;  %v1576_v48 = vadd.f32 %v246_v32, %v198_v7 }
  0x5f   :  { %v269_v49 = vmul.f32 %v1067_v35, %v1537_v12  ;;  %v338_v50 = vadd.f32 %v337_v37, %v332_v34  ;;  %v358_v39 = vmul.f32 %v357_v38, %v1369_v0  ;;  %v270_v51 = vmul.f32 %v1069_v40, %v1537_v12 }
  0x60   :  { %1084 = vtanh.f32 %v313_v10  ;;  %v339_v54 = vadd.f32 %v337_v37, %v333_v36  ;;  %v363_v55 = vstv %s1550_s12  ;;  %v271_v58 = vmul.f32 %v1071_v44, %v1537_v12  ;;  %s1767_s12 = sld [smem:[#allocation2 + $0x53]] }
  0x61   :  { %v1073_v56 = vpop.eup %1072  ;;  %1086 = vtanh.f32 %v314_v42  ;;  %v340_v59 = vadd.f32 %v337_v37, %v334_v43  ;;  %v359_v60 = vmul.f32 %v357_v38, %v1371_v2  ;;  %v341_v61 = vadd.f32 %v337_v37, %v335_v47 }
  0x62   :  { %1088 = vtanh.f32 %v315_v46  ;;  %v360_v62 = vmul.f32 %v357_v38, %v1373_v3  ;;  %v383_v53 = vstv %s1557_s13  ;;  %v1591_v1 = vadd.f32 %v269_v49, %v1532_v9  ;;  %s1771_s13 = sld [smem:[#allocation2 + $0x36]] }
  0x63   :  { %v1075_v63 = vpop.eup %1074  ;;  %1090 = vtanh.f32 %v338_v50  ;;  %v361_v5 = vmul.f32 %v357_v38, %v1375_v4  ;;  %v364_v6 = vadd.f32 %v363_v55, %v358_v39  ;;  %v272_v8 = vmul.f32 %v1073_v56, %v1537_v12 }
  0x64   :  { %v1077_v7 = vpop.eup %1076  ;;  %v1596_v13 = vadd.f32 %v270_v51, %v1534_v11  ;;  %1092 = vtanh.f32 %v339_v54  ;;  %v384_v14 = vmul.f32 %v383_v53, %v1369_v0  ;;  %v365_v17 = vadd.f32 %v363_v55, %v359_v60 }
  0x65   :  { %v1079_v16 = vpop.eup %1078  ;;  %1094 = vtanh.f32 %v340_v59  ;;  %v385_v9 = vmul.f32 %v383_v53, %v1371_v2  ;;  %v389_v18 = vstv %s1569_s14  ;;  %v366_v19 = vadd.f32 %v363_v55, %v360_v62  ;;  %s1785_s14 = sld [smem:[#allocation2 + $0x54]] }
  0x66   :  { %1096 = vtanh.f32 %v341_v61  ;;  %v386_v20 = vmul.f32 %v383_v53, %v1373_v3  ;;  %v409_v21 = vstv %s1574_s15  ;;  %v1606_v11 = vadd.f32 %v271_v58, %v1539_v52  ;;  %s1789_s15 = sld [smem:[#allocation2 + $0x17]] }
  0x67   :  { %v1081_v12 = vpop.eup %1080  ;;  %v1609_v22 = vstv %s1579_s16  ;;  %v367_v23 = vadd.f32 %v363_v55, %v361_v5  ;;  %1098 = vtanh.f32 %v364_v6  ;;  %v295_v57 = vmul.f32 %v1075_v63, %v1546_v24  ;;  %s1800_s16 = sld [smem:[#allocation2 + $0x37]] }
  0x68   :  { %v1083_v25 = vpop.eup %1082  ;;  %v296_v26 = vmul.f32 %v1077_v7, %v1546_v24  ;;  %v387_v27 = vmul.f32 %v383_v53, %v1375_v4  ;;  %v390_v29 = vadd.f32 %v389_v18, %v384_v14  ;;  %v297_v30 = vmul.f32 %v1079_v16, %v1546_v24 }
  0x69   :  { %1100 = vtanh.f32 %v365_v17  ;;  %v391_v52 = vadd.f32 %v389_v18, %v385_v9  ;;  %v410_v31 = vmul.f32 %v409_v21, %v1369_v0  ;;  %v392_v34 = vadd.f32 %v389_v18, %v386_v20 }
  0x6a   :  { %v1085_v32 = vpop.eup %1084  ;;  %1102 = vtanh.f32 %v366_v19  ;;  %v411_v35 = vmul.f32 %v409_v21, %v1371_v2  ;;  %v415_v10 = vstv %s1588_s17  ;;  %v276_v37 = vadd.f32 %v272_v8, %v1541_v15  ;;  %s1802_s17 = sld [smem:[#allocation2 + $0x55]] }
  0x6b   :  { %v1087_v36 = vpop.eup %1086  ;;  %v298_v38 = vmul.f32 %v1081_v12, %v1546_v24  ;;  %1104 = vtanh.f32 %v367_v23  ;;  %v412_v40 = vmul.f32 %v409_v21, %v1373_v3  ;;  %v321_v43 = vmul.f32 %v1083_v25, %v1554_v28 }
  0x6c   :  { %v1089_v42 = vpop.eup %1088  ;;  %v393_v44 = vadd.f32 %v389_v18, %v387_v27  ;;  %1106 = vtanh.f32 %v390_v29  ;;  %v413_v46 = vmul.f32 %v409_v21, %v1375_v4  ;;  %v299_v49 = vadd.f32 %v295_v57, %v1559_v33 }
  0x6d   :  { %v1091_v47 = vpop.eup %1090  ;;  %v300_v50 = vadd.f32 %v296_v26, %v1566_v41  ;;  %1108 = vtanh.f32 %v391_v52  ;;  %v416_v15 = vadd.f32 %v415_v10, %v410_v31  ;;  %v301_v39 = vadd.f32 %v297_v30, %v1571_v45 }
  0x6e   :  { %v1093_v24 = vpop.eup %1092  ;;  %1110 = vtanh.f32 %v392_v34  ;;  %v417_v51 = vadd.f32 %v415_v10, %v411_v35  ;;  %v435_v54 = vstv %s1603_s18  ;;  %v302_v56 = vadd.f32 %v298_v38, %v1576_v48  ;;  %s1806_s18 = sld [smem:[#allocation2 + $0x18]] }
  0x6f   :  { %v1095_v55 = vpop.eup %1094  ;;  %v322_v58 = vmul.f32 %v1085_v32, %v1554_v28  ;;  %v372_v33 = vstv %s1611_s19  ;;  %v418_v41 = vadd.f32 %v415_v10, %v412_v40  ;;  %v323_v60 = vmul.f32 %v1087_v36, %v1554_v28  ;;  %s1812_s19 = sld [smem:[#allocation2 + $0x56]] }
  0x70   :  { %v1097_v59 = vpop.eup %1096  ;;  %v325_v61 = vadd.f32 %v321_v43, %v1591_v1  ;;  %1112 = vtanh.f32 %v393_v44  ;;  %v419_v45 = vadd.f32 %v415_v10, %v413_v46  ;;  %v324_v53 = vmul.f32 %v1089_v42, %v1554_v28 }
  0x71   :  { %v1099_v62 = vpop.eup %1098  ;;  %v347_v63 = vmul.f32 %v1091_v47, %v1609_v22  ;;  %1114 = vtanh.f32 %v416_v15  ;;  %v436_v48 = vmul.f32 %v435_v54, %v1369_v0  ;;  %v348_v5 = vmul.f32 %v1093_v24, %v1609_v22 }
  0x72   :  { %1116 = vtanh.f32 %v417_v51  ;;  %v437_v6 = vmul.f32 %v435_v54, %v1371_v2  ;;  %v441_v7 = vstv %s1620_s20  ;;  %v349_v8 = vmul.f32 %v1095_v55, %v1609_v22  ;;  %s1815_s20 = sld [smem:[#allocation2 + $0x38]] }
  0x73   :  { %v1101_v1 = vpop.eup %1100  ;;  %v350_v14 = vmul.f32 %v1097_v59, %v1609_v22  ;;  %1118 = vtanh.f32 %v418_v41  ;;  %v438_v28 = vmul.f32 %v435_v54, %v1373_v3  ;;  %v326_v17 = vadd.f32 %v322_v58, %v1596_v13 }
  0x74   :  { %v1103_v16 = vpop.eup %1102  ;;  %v327_v9 = vadd.f32 %v323_v60, %v1606_v11  ;;  %v373_v18 = vmul.f32 %v1099_v62, %v372_v33  ;;  %1120 = vtanh.f32 %v419_v45  ;;  %v328_v20 = vadd.f32 %v324_v53, %v276_v37 }
  0x75   :  { %v1105_v19 = vpop.eup %1104  ;;  %v398_v21 = vstv %s1629_s21  ;;  %v439_v12 = vmul.f32 %v435_v54, %v1375_v4  ;;  %v442_v22 = vadd.f32 %v441_v7, %v436_v48  ;;  %v351_v25 = vadd.f32 %v347_v63, %v299_v49  ;;  %s1818_s21 = sld [smem:[#allocation2 + $0x57]] }
  0x76   :  { %v1107_v23 = vpop.eup %1106  ;;  %v352_v57 = vadd.f32 %v348_v5, %v300_v50  ;;  %v443_v26 = vadd.f32 %v441_v7, %v437_v6  ;;  %v461_v13 = vstv %s1633_s22  ;;  %v353_v11 = vadd.f32 %v349_v8, %v301_v39  ;;  %s1822_s22 = sld [smem:[#allocation2 + $0x19]] }
  0x77   :  { %v1109_v27 = vpop.eup %1108  ;;  %v354_v29 = vadd.f32 %v350_v14, %v302_v56  ;;  %v374_v30 = vmul.f32 %v1101_v1, %v372_v33  ;;  %v444_v52 = vadd.f32 %v441_v7, %v438_v28  ;;  %v375_v32 = vmul.f32 %v1103_v16, %v372_v33 }
  0x78   :  { %v1111_v31 = vpop.eup %1110  ;;  %v376_v34 = vmul.f32 %v1105_v19, %v372_v33  ;;  %v377_v35 = vadd.f32 %v373_v18, %v325_v61  ;;  %v424_v10 = vstv %s1640_s23  ;;  %v399_v36 = vmul.f32 %v1107_v23, %v398_v21  ;;  %s1829_s23 = sld [smem:[#allocation2 + $0x39]] }
  0x79   :  { %v445_v37 = vadd.f32 %v441_v7, %v439_v12  ;;  %1122 = vtanh.f32 %v442_v22  ;;  %v462_v38 = vmul.f32 %v461_v13, %v1369_v0  ;;  %v400_v42 = vmul.f32 %v1109_v27, %v398_v21 }
  0x7a   :  { %v1113_v40 = vpop.eup %1112  ;;  %1124 = vtanh.f32 %v443_v26  ;;  %v463_v43 = vmul.f32 %v461_v13, %v1371_v2  ;;  %v467_v44 = vstv %s1648_s24  ;;  %v378_v47 = vadd.f32 %v374_v30, %v326_v17  ;;  %s1831_s24 = sld [smem:[#allocation2 + $0x1a]] }
  0x7b   :  { %v1115_v46 = vpop.eup %1114  ;;  %v401_v49 = vmul.f32 %v1111_v31, %v398_v21  ;;  %1126 = vtanh.f32 %v444_v52  ;;  %v464_v50 = vmul.f32 %v461_v13, %v1373_v3  ;;  %v379_v24 = vadd.f32 %v375_v32, %v327_v9 }
  0x7c   :  { %v1117_v15 = vpop.eup %1116  ;;  %v380_v39 = vadd.f32 %v376_v34, %v328_v20  ;;  %v465_v51 = vmul.f32 %v461_v13, %v1375_v4  ;;  %v487_v54 = vstv %s1655_s25  ;;  %v402_v56 = vmul.f32 %v1113_v40, %v398_v21  ;;  %s1834_s25 = sld [smem:[#allocation2 + $0x58]] }
  0x7d   :  { %v1119_v55 = vpop.eup %1118  ;;  %v1675_v58 = vadd.f32 %v399_v36, %v351_v25  ;;  %v1678_v33 = vstv %s1658_s26  ;;  %v468_v41 = vadd.f32 %v467_v44, %v462_v38  ;;  %v1684_v60 = vadd.f32 %v400_v42, %v352_v57  ;;  %v1727_v36 = vld [vmem:[#allocation6] sm:$0xff]  ;;  %s1844_s26 = sld [smem:[#allocation2 + $0x3a]] }
  0x7e   :  { %v1121_v59 = vpop.eup %1120  ;;  %v425_v61 = vmul.f32 %v1115_v46, %v424_v10  ;;  %1128 = vtanh.f32 %v445_v37  ;;  %v469_v45 = vadd.f32 %v467_v44, %v463_v43  ;;  %v1688_v62 = vadd.f32 %v401_v49, %v353_v11  ;;  %v1740_v46 = vld [vmem:[#allocation6 + $0x10] sm:$0xff] }
  0x7f   :  { %v426_v53 = vmul.f32 %v1117_v15, %v424_v10  ;;  %v470_v63 = vadd.f32 %v467_v44, %v464_v50  ;;  %v488_v48 = vmul.f32 %v487_v54, %v1369_v0  ;;  %v427_v5 = vmul.f32 %v1119_v55, %v424_v10 }
  0x80   :  { %v471_v6 = vadd.f32 %v467_v44, %v465_v51  ;;  %v489_v7 = vmul.f32 %v487_v54, %v1371_v2  ;;  %v493_v1 = vstv %s1663_s27  ;;  %v1693_v8 = vadd.f32 %v402_v56, %v354_v29  ;;  %s1846_s27 = sld [smem:[#allocation2 + $0x1b]] }
  0x81   :  { %v428_v14 = vmul.f32 %v1121_v59, %v424_v10  ;;  %1130 = vtanh.f32 %v468_v41  ;;  %v513_v28 = vstv %s1666_s28  ;;  %v1700_v16 = vadd.f32 %v425_v61, %v377_v35  ;;  %s1854_s28 = sld [smem:[#allocation2 + $0x59]] }
  0x82   :  { %1132 = vtanh.f32 %v469_v45  ;;  %v1703_v17 = vstv %s1668_s30  ;;  %v490_v9 = vmul.f32 %v487_v54, %v1373_v3  ;;  %v1706_v19 = vadd.f32 %v426_v53, %v378_v47  ;;  %s1860_s30 = sld [smem:[#allocation2 + $0x3b]] }
  0x83   :  { %v1123_v18 = vpop.eup %1122  ;;  %1134 = vtanh.f32 %v470_v63  ;;  %v491_v20 = vmul.f32 %v487_v54, %v1375_v4  ;;  %v494_v21 = vadd.f32 %v493_v1, %v488_v48  ;;  %v1709_v22 = vadd.f32 %v427_v5, %v379_v24  ;;  %v1746_v24 = vld [vmem:[#allocation6 + $0x18] sm:$0xff] }
  0x84   :  { %v1125_v12 = vpop.eup %1124  ;;  %1136 = vtanh.f32 %v471_v6  ;;  %v495_v23 = vadd.f32 %v493_v1, %v489_v7  ;;  %v514_v25 = vmul.f32 %v513_v28, %v1369_v0  ;;  %v1712_v26 = vadd.f32 %v428_v14, %v380_v39 }
  0x85   :  { %v1127_v57 = vpop.eup %1126  ;;  %v515_v13 = vmul.f32 %v513_v28, %v1371_v2  ;;  %v519_v27 = vstv %s1680_s3  ;;  %v539_v11 = vstv %s1682_s4  ;;  %v451_v29 = vmul.f32 %v1123_v18, %v1678_v33  ;;  %s1865_s3 = sld [smem:[#allocation2 + $0x1c]] }
  0x86   :  { %v496_v30 = vadd.f32 %v493_v1, %v490_v9  ;;  %v1721_v52 = vstv %s1686_s5  ;;  %v516_v31 = vmul.f32 %v513_v28, %v1373_v3  ;;  %v452_v0 = vmul.f32 %v1125_v12, %v1678_v33  ;;  %v1732_v3 = vld [vmem:[#allocation6 + $0x8] sm:$0xff]  ;;  %s1879_s4 = sld [smem:[#allocation2 + $0x3c]]  ;;  %s1893_s5 = sld [smem:[#allocation2 + $0x1d]] }
  0x87   :  { %v497_v32 = vadd.f32 %v493_v1, %v491_v20  ;;  %1138 = vtanh.f32 %v494_v21  ;;  %v517_v34 = vmul.f32 %v513_v28, %v1375_v4  ;;  %v453_v35 = vmul.f32 %v1127_v57, %v1678_v33 }
  0x88   :  { %v1129_v2 = vpop.eup %1128  ;;  %1140 = vtanh.f32 %v495_v23  ;;  %v520_v10 = vadd.f32 %v519_v27, %v514_v25  ;;  %v540_v37 = vmul.f32 %v1727_v36, %v539_v11  ;;  %v521_v38 = vadd.f32 %v519_v27, %v515_v13 }
  0x89   :  { %v541_v40 = vmul.f32 %v1732_v3, %v539_v11  ;;  %v545_v42 = vstv %s1696_s6  ;;  %v565_v43 = vstv %s1698_s7  ;;  %v1738_v4 = vadd.f32 %v451_v29, %v1675_v58  ;;  %s1901_s6 = sld [smem:[#allocation2 + $0x3d]]  ;;  %s1905_s7 = sld [smem:[#allocation2 + $0x1e]] }
  0x8a   :  { %1142 = vtanh.f32 %v496_v30  ;;  %v522_v44 = vadd.f32 %v519_v27, %v516_v31  ;;  %v542_v47 = vmul.f32 %v1740_v46, %v539_v11  ;;  %v454_v50 = vmul.f32 %v1129_v2, %v1678_v33 }
  0x8b   :  { %v1131_v49 = vpop.eup %1130  ;;  %1144 = vtanh.f32 %v497_v32  ;;  %v523_v15 = vadd.f32 %v519_v27, %v517_v34  ;;  %v543_v39 = vmul.f32 %v1746_v24, %v539_v11  ;;  %v1752_v54 = vadd.f32 %v452_v0, %v1684_v60 }
  0x8c   :  { %v1133_v51 = vpop.eup %1132  ;;  %1146 = vtanh.f32 %v520_v10  ;;  %v546_v55 = vadd.f32 %v545_v42, %v540_v37  ;;  %v566_v56 = vmul.f32 %v1727_v36, %v565_v43  ;;  %v547_v33 = vadd.f32 %v545_v42, %v541_v40 }
  0x8d   :  { %v1135_v58 = vpop.eup %1134  ;;  %1148 = vtanh.f32 %v521_v38  ;;  %v567_v41 = vmul.f32 %v1732_v3, %v565_v43  ;;  %v571_v59 = vstv %s1717_s8  ;;  %v1760_v45 = vadd.f32 %v453_v35, %v1688_v62  ;;  %s1917_s8 = sld [smem:[#allocation2 + $0x3e]] }
  0x8e   :  { %v1137_v61 = vpop.eup %1136  ;;  %1150 = vtanh.f32 %v522_v44  ;;  %v548_v60 = vadd.f32 %v545_v42, %v542_v47  ;;  %v568_v53 = vmul.f32 %v1740_v46, %v565_v43  ;;  %v1764_v63 = vadd.f32 %v454_v50, %v1693_v8 }
  0x8f   :  { %v477_v48 = vmul.f32 %v1131_v49, %v1703_v17  ;;  %1152 = vtanh.f32 %v523_v15  ;;  %v549_v5 = vadd.f32 %v545_v42, %v543_v39  ;;  %v569_v6 = vmul.f32 %v1746_v24, %v565_v43 }
  0x90   :  { %1154 = vtanh.f32 %v546_v55  ;;  %v572_v7 = vadd.f32 %v571_v59, %v566_v56  ;;  %v591_v62 = vstv %s1730_s1  ;;  %v478_v14 = vmul.f32 %v1133_v51, %v1703_v17  ;;  %s1920_s1 = sld [smem:[#allocation2 + $0x5a]] }
  0x91   :  { %v1139_v1 = vpop.eup %1138  ;;  %v479_v8 = vmul.f32 %v1135_v58, %v1703_v17  ;;  %1156 = vtanh.f32 %v547_v33  ;;  %v573_v28 = vadd.f32 %v571_v59, %v567_v41  ;;  %v480_v18 = vmul.f32 %v1137_v61, %v1703_v17 }
  0x92   :  { %v1141_v9 = vpop.eup %1140  ;;  %1158 = vtanh.f32 %v548_v60  ;;  %v574_v20 = vadd.f32 %v571_v59, %v568_v53  ;;  %v592_v21 = vmul.f32 %v1727_v36, %v591_v62  ;;  %v528_v12 = vstv %s1744_s9  ;;  %s1930_s9 = sld [smem:[#allocation2 + $0x1f]] }
  0x93   :  { %1160 = vtanh.f32 %v549_v5  ;;  %v593_v23 = vmul.f32 %v1732_v3, %v591_v62  ;;  %v597_v25 = vstv %s1749_s10  ;;  %v575_v13 = vadd.f32 %v571_v59, %v569_v6  ;;  %s1933_s10 = sld [smem:[#allocation2 + $0x5b]] }
  0x94   :  { %v1143_v57 = vpop.eup %1142  ;;  %1162 = vtanh.f32 %v572_v7  ;;  %v594_v27 = vmul.f32 %v1740_v46, %v591_v62  ;;  %v617_v11 = vstv %s1755_s11  ;;  %v481_v30 = vadd.f32 %v477_v48, %v1700_v16  ;;  %s1939_s11 = sld [smem:[#allocation2 + $0x3f]] }
  0x95   :  { %v1145_v29 = vpop.eup %1144  ;;  %v482_v17 = vadd.f32 %v478_v14, %v1706_v19  ;;  %v483_v31 = vadd.f32 %v479_v8, %v1709_v22  ;;  %1164 = vtanh.f32 %v573_v28  ;;  %v484_v32 = vadd.f32 %v480_v18, %v1712_v26 }
  0x96   :  { %v1147_v0 = vpop.eup %1146  ;;  %1166 = vtanh.f32 %v574_v20  ;;  %v595_v34 = vmul.f32 %v1746_v24, %v591_v62  ;;  %v598_v2 = vadd.f32 %v597_v25, %v592_v21  ;;  %v503_v16 = vmul.f32 %v1139_v1, %v1721_v52 }
  0x97   :  { %v1149_v35 = vpop.eup %1148  ;;  %v554_v10 = vstv %s1767_s12  ;;  %v599_v19 = vadd.f32 %v597_v25, %v593_v23  ;;  %v618_v22 = vmul.f32 %v1727_v36, %v617_v11  ;;  %1168 = vtanh.f32 %v575_v13  ;;  %s1947_s12 = sld [smem:[#allocation2 + $0x5c]] }
  0x98   :  { %v1151_v37 = vpop.eup %1150  ;;  %v600_v38 = vadd.f32 %v597_v25, %v594_v27  ;;  %v619_v40 = vmul.f32 %v1732_v3, %v617_v11  ;;  %v623_v42 = vstv %s1771_s13  ;;  %v504_v43 = vmul.f32 %v1141_v9, %v1721_v52  ;;  %s1953_s13 = sld [smem:[#allocation2 + $0x5d]] }
  0x99   :  { %v1153_v26 = vpop.eup %1152  ;;  %v505_v44 = vmul.f32 %v1143_v57, %v1721_v52  ;;  %v506_v47 = vmul.f32 %v1145_v29, %v1721_v52  ;;  %v529_v49 = vmul.f32 %v1147_v0, %v528_v12  ;;  %v530_v15 = vmul.f32 %v1149_v35, %v528_v12 }
  0x9a   :  { %v1155_v50 = vpop.eup %1154  ;;  %v601_v39 = vadd.f32 %v597_v25, %v595_v34  ;;  %1170 = vtanh.f32 %v598_v2  ;;  %v620_v51 = vmul.f32 %v1740_v46, %v617_v11  ;;  %v531_v56 = vmul.f32 %v1151_v37, %v528_v12 }
  0x9b   :  { %v1157_v55 = vpop.eup %1156  ;;  %1172 = vtanh.f32 %v599_v19  ;;  %v621_v58 = vmul.f32 %v1746_v24, %v617_v11  ;;  %v624_v33 = vadd.f32 %v623_v42, %v618_v22  ;;  %v507_v52 = vadd.f32 %v503_v16, %v1738_v4 }
  0x9c   :  { %v1159_v41 = vpop.eup %1158  ;;  %v532_v59 = vmul.f32 %v1153_v26, %v528_v12  ;;  %1174 = vtanh.f32 %v600_v38  ;;  %v625_v61 = vadd.f32 %v623_v42, %v619_v40  ;;  %v508_v53 = vadd.f32 %v504_v43, %v1752_v54 }
  0x9d   :  { %v1161_v60 = vpop.eup %1160  ;;  %v509_v48 = vadd.f32 %v505_v44, %v1760_v45  ;;  %v510_v5 = vadd.f32 %v506_v47, %v1764_v63  ;;  %v580_v6 = vstv %s1785_s14  ;;  %v533_v62 = vadd.f32 %v529_v49, %v481_v30  ;;  %s1961_s14 = sld [smem:[#allocation2 + $0x5e]] }
  0x9e   :  { %v1163_v7 = vpop.eup %1162  ;;  %1176 = vtanh.f32 %v601_v39  ;;  %v626_v1 = vadd.f32 %v623_v42, %v620_v51  ;;  %v643_v4 = vstv %s1789_s15  ;;  %v534_v8 = vadd.f32 %v530_v15, %v482_v17  ;;  %s1970_s15 = sld [smem:[#allocation2 + $0x5f]] }
  0x9f   :  { %v1165_v14 = vpop.eup %1164  ;;  %v535_v28 = vadd.f32 %v531_v56, %v483_v31  ;;  %v627_v9 = vadd.f32 %v623_v42, %v621_v58  ;;  %1178 = vtanh.f32 %v624_v33  ;;  %v536_v54 = vadd.f32 %v532_v59, %v484_v32 }
  0xa0   :  { %v1167_v18 = vpop.eup %1166  ;;  %v555_v20 = vmul.f32 %v1155_v50, %v554_v10  ;;  %v556_v45 = vmul.f32 %v1157_v55, %v554_v10  ;;  %1180 = vtanh.f32 %v625_v61  ;;  %v557_v63 = vmul.f32 %v1159_v41, %v554_v10 }
  0xa1   :  { %v558_v21 = vmul.f32 %v1161_v60, %v554_v10  ;;  %v581_v12 = vmul.f32 %v1163_v7, %v580_v6  ;;  %v644_v23 = vmul.f32 %v1727_v36, %v643_v4  ;;  %v1169_v25 = vpop.eup %1168  ;;  %v582_v57 = vmul.f32 %v1165_v14, %v580_v6 }
  0xa2   :  { %1182 = vtanh.f32 %v626_v1  ;;  %v645_v13 = vmul.f32 %v1732_v3, %v643_v4  ;;  %v649_v27 = vstv %s1800_s16  ;;  %v583_v11 = vmul.f32 %v1167_v18, %v580_v6  ;;  %s1326_s16 = smov [#allocation7]  }
  0xa3   :  { %v606_v29 = vstv %s1802_s17  ;;  %1184 = vtanh.f32 %v627_v9  ;;  %v646_v30 = vmul.f32 %v1740_v46, %v643_v4  ;;  %v559_v31 = vadd.f32 %v555_v20, %v507_v52  ;;  %s888_s17 = sshll.u32 %s1326_s16, 4  ;;  %s889_s17 = int_to_ptr.vmem [resolvable:$true] %s888_s17 }
  0xa4   :  { %v1171_v17 = vpop.eup %1170  ;;  %v560_v0 = vadd.f32 %v556_v45, %v508_v53  ;;  %v647_v32 = vmul.f32 %v1746_v24, %v643_v4  ;;  %v669_v34 = vstv %s1806_s18  ;;  %v561_v35 = vadd.f32 %v557_v63, %v509_v48  ;;  %s1294_s18 = scalar_lea.vmem %s889_s17, 512  ;;  %p1299_p12 = scmp.lt.s32.totalorder %s889_s17, %s889_s17 }
  0xa5   :  { %v1173_v2 = vpop.eup %1172  ;;  %v562_v16 = vadd.f32 %v558_v21, %v510_v5  ;;  %v584_v10 = vmul.f32 %v1169_v25, %v580_v6  ;;  %v650_v19 = vadd.f32 %v649_v27, %v644_v23  ;;  %v585_v37 = vadd.f32 %v581_v12, %v533_v62  ;;  %p1295_p11 = scmp.ne.s32.totalorder %s889_s17, %s1294_s18  ;;  %p1300_p13 = scmp.lt.s32.totalorder %s1294_s18, %s1294_s18 }
  0xa6   :  { %v1175_v22 = vpop.eup %1174  ;;  %v586_v38 = vadd.f32 %v582_v57, %v534_v8  ;;  %v632_v40 = vstv %s1812_s19  ;;  %v651_v42 = vadd.f32 %v649_v27, %v645_v13  ;;  %v587_v26 = vadd.f32 %v583_v11, %v535_v28 }
  0xa7   :  { %v607_v43 = vmul.f32 %v1171_v17, %v606_v29  ;;  %v652_v44 = vadd.f32 %v649_v27, %v646_v30  ;;  %v670_v47 = vmul.f32 %v1727_v36, %v669_v34  ;;  %v608_v50 = vmul.f32 %v1173_v2, %v606_v29  ;;  %p1301_p0 = por %p1300_p13, %p1299_p12 }
  0xa8   :  { %v1177_v49 = vpop.eup %1176  ;;  %v653_v15 = vadd.f32 %v649_v27, %v647_v32  ;;  %v671_v39 = vmul.f32 %v1732_v3, %v669_v34  ;;  %v675_v51 = vstv %s1815_s20  ;;  %v588_v56 = vadd.f32 %v584_v10, %v536_v54 }
  0xa9   :  { %v1179_v55 = vpop.eup %1178  ;;  %v609_v58 = vmul.f32 %v1175_v22, %v606_v29  ;;  %1186 = vtanh.f32 %v650_v19  ;;  %v672_v33 = vmul.f32 %v1740_v46, %v669_v34  ;;  %v1840_v52 = vstv %s1818_s21  ;;  %p1302_p1 = pnand %p1301_p0, %p1295_p11 }
  0xaa   :  { %v1181_v41 = vpop.eup %1180  ;;  %1188 = vtanh.f32 %v651_v42  ;;  %v673_v59 = vmul.f32 %v1746_v24, %v669_v34  ;;  %v695_v61 = vstv %s1822_s22  ;;  %v610_v60 = vmul.f32 %v1177_v49, %v606_v29 }
  0xab   :  { %v1848_v53 = vadd.f32 %v607_v43, %v559_v31  ;;  %1190 = vtanh.f32 %v652_v44  ;;  %v676_v48 = vadd.f32 %v675_v51, %v670_v47  ;;  %v1850_v6 = vadd.f32 %v608_v50, %v560_v0 }
  0xac   :  { %v1183_v5 = vpop.eup %1182  ;;  %v633_v7 = vmul.f32 %v1179_v55, %v632_v40  ;;  %1192 = vtanh.f32 %v653_v15  ;;  %v677_v62 = vadd.f32 %v675_v51, %v671_v39  ;;  %v1852_v4 = vadd.f32 %v609_v58, %v561_v35 }
  0xad   :  { %v1185_v1 = vpop.eup %1184  ;;  %v634_v14 = vmul.f32 %v1181_v41, %v632_v40  ;;  %v678_v8 = vadd.f32 %v675_v51, %v672_v33  ;;  %v696_v28 = vmul.f32 %v1727_v36, %v695_v61  ;;  %v679_v9 = vadd.f32 %v675_v51, %v673_v59 }
  0xae   :  { %v697_v18 = vmul.f32 %v1732_v3, %v695_v61  ;;  %v701_v54 = vstv %s1829_s23  ;;  %v721_v20 = vstv %s1831_s24  ;;  %v1862_v45 = vadd.f32 %v610_v60, %v562_v16 }
  0xaf   :  { %v635_v63 = vmul.f32 %v1183_v5, %v632_v40  ;;  %1194 = vtanh.f32 %v676_v48  ;;  %v698_v21 = vmul.f32 %v1740_v46, %v695_v61  ;;  %v636_v12 = vmul.f32 %v1185_v1, %v632_v40 }
  0xb0   :  { %v1867_v23 = vadd.f32 %v633_v7, %v585_v37  ;;  %v1870_v25 = vstv %s1834_s25  ;;  %v699_v57 = vmul.f32 %v1746_v24, %v695_v61  ;;  %v1873_v13 = vadd.f32 %v634_v14, %v586_v38 }
  0xb1   :  { %1196 = vtanh.f32 %v677_v62  ;;  %v702_v27 = vadd.f32 %v701_v54, %v696_v28  ;;  %v722_v11 = vmul.f32 %v1727_v36, %v721_v20  ;;  %v703_v29 = vadd.f32 %v701_v54, %v697_v18 }
  0xb2   :  { %v723_v30 = vmul.f32 %v1732_v3, %v721_v20  ;;  %v727_v17 = vstv %s1844_s26  ;;  %v747_v31 = vstv %s1846_s27  ;;  %v1881_v32 = vadd.f32 %v635_v63, %v587_v26 }
  0xb3   :  { %v1187_v0 = vpop.eup %1186  ;;  %1198 = vtanh.f32 %v678_v8  ;;  %v704_v34 = vadd.f32 %v701_v54, %v698_v21  ;;  %v724_v2 = vmul.f32 %v1740_v46, %v721_v20  ;;  %v1884_v16 = vadd.f32 %v636_v12, %v588_v56 }
  0xb4   :  { %v1189_v35 = vpop.eup %1188  ;;  %1200 = vtanh.f32 %v679_v9  ;;  %v705_v10 = vadd.f32 %v701_v54, %v699_v57  ;;  %v725_v19 = vmul.f32 %v1746_v24, %v721_v20  ;;  %v1888_v37 = vstv %s1854_s28 }
  0xb5   :  { %v1191_v22 = vpop.eup %1190  ;;  %1202 = vtanh.f32 %v702_v27  ;;  %v728_v38 = vadd.f32 %v727_v17, %v722_v11  ;;  %v748_v40 = vmul.f32 %v1727_v36, %v747_v31  ;;  %v729_v26 = vadd.f32 %v727_v17, %v723_v30 }
  0xb6   :  { %v1193_v42 = vpop.eup %1192  ;;  %1204 = vtanh.f32 %v703_v29  ;;  %v749_v43 = vmul.f32 %v1732_v3, %v747_v31  ;;  %v753_v44 = vstv %s1860_s30  ;;  %v730_v47 = vadd.f32 %v727_v17, %v724_v2 }
  0xb7   :  { %1206 = vtanh.f32 %v704_v34  ;;  %v750_v49 = vmul.f32 %v1740_v46, %v747_v31  ;;  %v773_v50 = vstv %s1865_s3  ;;  %v659_v15 = vmul.f32 %v1187_v0, %v1840_v52 }
  0xb8   :  { %1208 = vtanh.f32 %v705_v10  ;;  %v731_v39 = vadd.f32 %v727_v17, %v725_v19  ;;  %v751_v51 = vmul.f32 %v1746_v24, %v747_v31  ;;  %v660_v56 = vmul.f32 %v1189_v35, %v1840_v52 }
  0xb9   :  { %v1195_v55 = vpop.eup %1194  ;;  %1210 = vtanh.f32 %v728_v38  ;;  %v754_v58 = vadd.f32 %v753_v44, %v748_v40  ;;  %v774_v33 = vmul.f32 %v1727_v36, %v773_v50  ;;  %v755_v41 = vadd.f32 %v753_v44, %v749_v43 }
  0xba   :  { %1212 = vtanh.f32 %v729_v26  ;;  %v775_v59 = vmul.f32 %v1732_v3, %v773_v50  ;;  %v779_v61 = vstv %s1879_s4  ;;  %v661_v48 = vmul.f32 %v1191_v22, %v1840_v52 }
  0xbb   :  { %v1197_v60 = vpop.eup %1196  ;;  %1214 = vtanh.f32 %v730_v47  ;;  %v756_v5 = vadd.f32 %v753_v44, %v750_v49  ;;  %v776_v7 = vmul.f32 %v1740_v46, %v773_v50  ;;  %v1910_v62 = vadd.f32 %v659_v15, %v1848_v53 }
  0xbc   :  { %1216 = vtanh.f32 %v731_v39  ;;  %v757_v1 = vadd.f32 %v753_v44, %v751_v51  ;;  %v777_v14 = vmul.f32 %v1746_v24, %v773_v50  ;;  %v662_v28 = vmul.f32 %v1193_v42, %v1840_v52 }
  0xbd   :  { %v1199_v8 = vpop.eup %1198  ;;  %v1915_v9 = vadd.f32 %v660_v56, %v1850_v6  ;;  %1218 = vtanh.f32 %v754_v58  ;;  %v780_v18 = vadd.f32 %v779_v61, %v774_v33  ;;  %v685_v20 = vmul.f32 %v1195_v55, %v1870_v25 }
  0xbe   :  { %v1201_v54 = vpop.eup %1200  ;;  %1220 = vtanh.f32 %v755_v41  ;;  %v781_v53 = vadd.f32 %v779_v61, %v775_v59  ;;  %v799_v63 = vstv %s1893_s5  ;;  %v686_v12 = vmul.f32 %v1197_v60, %v1870_v25 }
  0xbf   :  { %v1203_v21 = vpop.eup %1202  ;;  %1222 = vtanh.f32 %v756_v5  ;;  %v782_v52 = vadd.f32 %v779_v61, %v776_v7  ;;  %v800_v6 = vmul.f32 %v1727_v36, %v799_v63  ;;  %v783_v27 = vadd.f32 %v779_v61, %v777_v14 }
  0xc0   :  { %v1205_v57 = vpop.eup %1204  ;;  %1224 = vtanh.f32 %v757_v1  ;;  %v801_v11 = vmul.f32 %v1732_v3, %v799_v63  ;;  %v802_v29 = vmul.f32 %v1740_v46, %v799_v63  ;;  %v687_v17 = vmul.f32 %v1199_v8, %v1870_v25 }
  0xc1   :  { %v1207_v30 = vpop.eup %1206  ;;  %1226 = vtanh.f32 %v780_v18  ;;  %v803_v31 = vmul.f32 %v1746_v24, %v799_v63  ;;  %v805_v0 = vstv %s1901_s6  ;;  %v825_v10 = vstv %s1905_s7 }
  0xc2   :  { %v1209_v34 = vpop.eup %1208  ;;  %1228 = vtanh.f32 %v781_v53  ;;  %v806_v2 = vadd.f32 %v805_v0, %v800_v6  ;;  %v807_v35 = vadd.f32 %v805_v0, %v801_v11  ;;  %v808_v22 = vadd.f32 %v805_v0, %v802_v29 }
  0xc3   :  { %v1211_v19 = vpop.eup %1210  ;;  %1230 = vtanh.f32 %v782_v52  ;;  %v826_v38 = vmul.f32 %v1727_v36, %v825_v10  ;;  %v827_v40 = vmul.f32 %v1732_v3, %v825_v10  ;;  %v809_v26 = vadd.f32 %v805_v0, %v803_v31 }
  0xc4   :  { %v1213_v42 = vpop.eup %1212  ;;  %1232 = vtanh.f32 %v783_v27  ;;  %v828_v43 = vmul.f32 %v1740_v46, %v825_v10  ;;  %v829_v44 = vmul.f32 %v1746_v24, %v825_v10  ;;  %v665_v49 = vadd.f32 %v661_v48, %v1852_v4 }
  0xc5   :  { %v1215_v47 = vpop.eup %1214  ;;  %v666_v50 = vadd.f32 %v662_v28, %v1862_v45  ;;  %1234 = vtanh.f32 %v806_v2  ;;  %v831_v15 = vstv %s1917_s8  ;;  %v688_v51 = vmul.f32 %v1201_v54, %v1870_v25 }
  0xc6   :  { %v1217_v39 = vpop.eup %1216  ;;  %v736_v55 = vstv %s1920_s1  ;;  %1236 = vtanh.f32 %v807_v35  ;;  %v832_v56 = vadd.f32 %v831_v15, %v826_v38  ;;  %v689_v33 = vadd.f32 %v685_v20, %v1867_v23 }
  0xc7   :  { %v1219_v58 = vpop.eup %1218  ;;  %1238 = vtanh.f32 %v808_v22  ;;  %v833_v41 = vadd.f32 %v831_v15, %v827_v40  ;;  %v834_v59 = vadd.f32 %v831_v15, %v828_v43  ;;  %v690_v45 = vadd.f32 %v686_v12, %v1873_v13 }
  0xc8   :  { %v1221_v4 = vpop.eup %1220  ;;  %v691_v61 = vadd.f32 %v687_v17, %v1881_v32  ;;  %1240 = vtanh.f32 %v809_v26  ;;  %v835_v25 = vadd.f32 %v831_v15, %v829_v44  ;;  %v711_v48 = vmul.f32 %v1203_v21, %v1888_v37 }
  0xc9   :  { %v1223_v60 = vpop.eup %1222  ;;  %v712_v5 = vmul.f32 %v1205_v57, %v1888_v37  ;;  %1242 = vtanh.f32 %v832_v56  ;;  %v851_v23 = vstv %s1930_s9  ;;  %v692_v1 = vadd.f32 %v688_v51, %v1884_v16 }
  0xca   :  { %v1225_v7 = vpop.eup %1224  ;;  %v713_v13 = vmul.f32 %v1207_v30, %v1888_v37  ;;  %1244 = vtanh.f32 %v833_v41  ;;  %v852_v32 = vmul.f32 %v1727_v36, %v851_v23  ;;  %v714_v8 = vmul.f32 %v1209_v34, %v1888_v37 }
  0xcb   :  { %v1227_v14 = vpop.eup %1226  ;;  %v762_v28 = vstv %s1933_s10  ;;  %1246 = vtanh.f32 %v834_v59  ;;  %v853_v18 = vmul.f32 %v1732_v3, %v851_v23  ;;  %v854_v20 = vmul.f32 %v1740_v46, %v851_v23 }
  0xcc   :  { %v1229_v54 = vpop.eup %1228  ;;  %1248 = vtanh.f32 %v835_v25  ;;  %v855_v16 = vmul.f32 %v1746_v24, %v851_v23  ;;  %v857_v53 = vstv %s1939_s11  ;;  %v715_v36 = vadd.f32 %v711_v48, %v1910_v62 }
  0xcd   :  { %v1231_v63 = vpop.eup %1230  ;;  %v716_v21 = vadd.f32 %v712_v5, %v1915_v9  ;;  %v858_v37 = vadd.f32 %v857_v53, %v852_v32  ;;  %v859_v12 = vadd.f32 %v857_v53, %v853_v18  ;;  %v717_v6 = vadd.f32 %v713_v13, %v665_v49 }
  0xce   :  { %v1233_v52 = vpop.eup %1232  ;;  %v737_v57 = vmul.f32 %v1211_v19, %v736_v55  ;;  %v860_v27 = vadd.f32 %v857_v53, %v854_v20  ;;  %v861_v3 = vadd.f32 %v857_v53, %v855_v16  ;;  %v738_v29 = vmul.f32 %v1213_v42, %v736_v55 }
  0xcf   :  { %v1235_v11 = vpop.eup %1234  ;;  %v739_v46 = vmul.f32 %v1215_v47, %v736_v55  ;;  %v788_v30 = vstv %s1947_s12  ;;  %1250 = vtanh.f32 %v858_v37  ;;  %v718_v17 = vadd.f32 %v714_v8, %v666_v50 }
  0xd0   :  { %v1237_v24 = vpop.eup %1236  ;;  %v740_v62 = vmul.f32 %v1217_v39, %v736_v55  ;;  %v763_v31 = vmul.f32 %v1219_v58, %v762_v28  ;;  %1252 = vtanh.f32 %v859_v12  ;;  %v764_v0 = vmul.f32 %v1221_v4, %v762_v28 }
  0xd1   :  { %v1239_v9 = vpop.eup %1238  ;;  %v765_v34 = vmul.f32 %v1223_v60, %v762_v28  ;;  %v814_v2 = vstv %s1953_s13  ;;  %1254 = vtanh.f32 %v860_v27  ;;  %v741_v10 = vadd.f32 %v737_v57, %v689_v33 }
  0xd2   :  { %v1241_v35 = vpop.eup %1240  ;;  %v766_v19 = vmul.f32 %v1225_v7, %v762_v28  ;;  %v789_v22 = vmul.f32 %v1227_v14, %v788_v30  ;;  %1256 = vtanh.f32 %v861_v3  ;;  %v742_v40 = vadd.f32 %v738_v29, %v690_v45 }
  0xd3   :  { %v1243_v38 = vpop.eup %1242  ;;  %v743_v42 = vadd.f32 %v739_v46, %v691_v61  ;;  %v790_v26 = vmul.f32 %v1229_v54, %v788_v30  ;;  %v840_v43 = vstv %s1961_s14  ;;  %v744_v47 = vadd.f32 %v740_v62, %v692_v1 }
  0xd4   :  { %v1245_v44 = vpop.eup %1244  ;;  %v767_v49 = vadd.f32 %v763_v31, %v715_v36  ;;  %v791_v50 = vmul.f32 %v1231_v63, %v788_v30  ;;  %v815_v15 = vmul.f32 %v1235_v11, %v814_v2  ;;  %v768_v51 = vadd.f32 %v764_v0, %v716_v21 }
  0xd5   :  { %v1247_v39 = vpop.eup %1246  ;;  %v769_v55 = vadd.f32 %v765_v34, %v717_v6  ;;  %v792_v56 = vmul.f32 %v1233_v52, %v788_v30  ;;  %v816_v58 = vmul.f32 %v1237_v24, %v814_v2  ;;  %v770_v41 = vadd.f32 %v766_v19, %v718_v17 }
  0xd6   :  { %v1249_v33 = vpop.eup %1248  ;;  %v793_v59 = vadd.f32 %v789_v22, %v741_v10  ;;  %v817_v4 = vmul.f32 %v1239_v9, %v814_v2  ;;  %v841_v25 = vmul.f32 %v1243_v38, %v840_v43  ;;  %v794_v45 = vadd.f32 %v790_v26, %v742_v40 }
  0xd7   :  { %v818_v61 = vmul.f32 %v1241_v35, %v814_v2  ;;  %v842_v60 = vmul.f32 %v1245_v44, %v840_v43  ;;  %v866_v48 = vstv %s1970_s15  ;;  %v795_v5 = vadd.f32 %v791_v50, %v743_v42 }
  0xd8   :  { %v819_v23 = vadd.f32 %v815_v15, %v767_v49  ;;  %v843_v7 = vmul.f32 %v1247_v39, %v840_v43  ;;  %v796_v13 = vadd.f32 %v792_v56, %v744_v47  ;;  %v820_v32 = vadd.f32 %v816_v58, %v768_v51 }
  0xd9   :  { %v1251_v1 = vpop.eup %1250  ;;  %v844_v14 = vmul.f32 %v1249_v33, %v840_v43  ;;  %v821_v28 = vadd.f32 %v817_v4, %v769_v55  ;;  %v845_v18 = vadd.f32 %v841_v25, %v793_v59  ;;  %v822_v16 = vadd.f32 %v818_v61, %v770_v41 }
  0xda   :  { %v1253_v8 = vpop.eup %1252  ;;  %v867_v54 = vmul.f32 %v1251_v1, %v866_v48  ;;  %v846_v53 = vadd.f32 %v842_v60, %v794_v45  ;;  %v847_v21 = vadd.f32 %v843_v7, %v795_v5 }
  0xdb   :  { %v1255_v20 = vpop.eup %1254  ;;  %v868_v63 = vmul.f32 %v1253_v8, %v866_v48  ;;  %v848_v52 = vadd.f32 %v844_v14, %v796_v13 }
  0xdc   :  { %v1257_v36 = vpop.eup %1256  ;;  %v869_v37 = vmul.f32 %v1255_v20, %v866_v48  ;;  %v871_v12 = vadd.f32 %v867_v54, %v819_v23 }
  0xdd   :  { %v870_v6 = vmul.f32 %v1257_v36, %v866_v48  ;;  %v872_v57 = vadd.f32 %v868_v63, %v820_v32 }
  0xde   :  { %v873_v27 = vadd.f32 %v869_v37, %v821_v28  ;;  %v875_v3 = vadd.f32 %v871_v12, %v845_v18 }
  0xdf   :  { %v874_v11 = vadd.f32 %v870_v6, %v822_v16  ;;  %v876_v29 = vadd.f32 %v872_v57, %v846_v53 }
  0xe0   :  { %v877_v46 = vadd.f32 %v873_v27, %v847_v21  ;;  %879 = vst [vmem:[#allocation7] sm:$0xff] %v875_v3 }
  0xe1   :  { %v878_v30 = vadd.f32 %v874_v11, %v848_v52  ;;  %880 = vst [vmem:[#allocation7 + $0x8] sm:$0xff] %v876_v29 }
  0xe2   :  { %881 = vst [vmem:[#allocation7 + $0x10] sm:$0xff] %v877_v46 }
  0xe3   :  { %882 = vst [vmem:[#allocation7 + $0x18] sm:$0xff] %v878_v30 }
  0xe4   :  { %1305 = shalt.err (!%p1302_p1)
}
  0xe5   :  { %s1306_s21 = scalar_lea.hbm %s1992_s2, 512 }
  0xe6   :  { %p1307_p2 = scmp.ne.s32.totalorder %s1992_s2, %s1306_s21  ;;  %p1310_p3 = scmp.lt.u32.totalorder %s1306_s21, %s1992_s2 }
  0xe8   :  { %p1312_p4 = pnand %p1310_p3, %p1307_p2 }
  0xea   :  { %1315 = shalt.err (!%p1312_p4)
}
  0xeb   :  { %894 = dma.vmem_to_hbm [thread:$0]  %s889_s17, 512, %s1992_s2, [#allocation4], %s1324_s0, %s1324_s0, %s1325_s29  }
  0xec   :  { %1320 = dma.done.wait [#allocation4], 512  }
  0xed   :  { %1321 = vsyncadd [#allocation4], 4294966784 }
  0xee   :  { %898 = vsyncpa [#allocation3], 1 }
  0xef   :  { %899 = vsyncpa [#allocation4], 1 }
  0xf0   :  { %900 = vsyncpa [#allocation5], 1 }

</bundles_post_ra>
